<compile_context>
chip_gen: v6e
topology: v6e:2x2x1
jax: 0.10.0
libtpu: 0.0.40
codegen_flags: <defaults>
</compile_context>

<pallas_src>
import jax
import jax.numpy as jnp
from jax.experimental import pallas as pl
from jax.experimental.pallas import tpu as pltpu

EPS = 1e-05


def fused_scale_conv_bn_kernel(params_ref, x_ref, w_ref, o_ref):
    # params_ref : (C, 3)     col 0 = per-Cin scale (x356), col 1 = BN gamma, col 2 = BN beta
    # x_ref      : (Cin, P)   activations (x351), channels-major, P = N*H*W lanes
    # w_ref      : (blk, Cin) this Cout block's rows of the 1x1 conv weight
    # o_ref      : (blk, P)   this Cout block's output rows
    blk = w_ref.shape[0]

    # Per-Cin scale applied to the activation slab (kept inside the kernel).
    scale = params_ref[:, 0:1]                                  # (Cin, 1)
    x_scaled = x_ref[...] * scale                               # (Cin, P)   VPU

    # 1x1 convolution == matmul on the MXU, f32 accumulation.
    y = jnp.dot(w_ref[...], x_scaled,
                preferred_element_type=jnp.float32)             # (blk, P)

    # BN affine params for this Cout block (block start is 8-aligned: blk % 8 == 0).
    start = pl.multiple_of(pl.program_id(0) * blk, blk)
    blk_prm = params_ref[pl.ds(start, blk), :]                  # (blk, 3)
    gamma = blk_prm[:, 1:2]                                     # (blk, 1)
    beta = blk_prm[:, 2:3]                                      # (blk, 1)

    # Training-mode BatchNorm2d forward: biased batch stats over the P axis.
    # Two-pass (centered) variance for numerical robustness.
    inv_p = 1.0 / y.shape[1]
    mean = jnp.sum(y, axis=1, keepdims=True) * inv_p            # (blk, 1)
    centered = y - mean
    var = jnp.sum(centered * centered, axis=1, keepdims=True) * inv_p
    inv_std = jax.lax.rsqrt(var + EPS)

    # Single FMA pass: out = centered * (gamma * inv_std) + beta.
    o_ref[...] = centered * (gamma * inv_std) + beta


def fused_scale_conv_bn(x356, x351, conv_w, bn_gamma, bn_beta, *, num_blocks=2):
    """x356: (N, C, 1, 1), x351: (N, C, H, W), conv_w: (Cout, Cin, 1, 1)."""
    n, c, h, w = x351.shape
    assert n == 1, "zero-copy NCHW -> (C, P) layout requires N == 1"
    cout, cin = conv_w.shape[0], conv_w.shape[1]
    assert cin == c and cout == c, (cout, cin, c)
    assert c % num_blocks == 0 and (c // num_blocks) % 8 == 0
    p = n * h * w
    blk = c // num_blocks

    # N==1: NCHW -> (C, P) is a zero-copy reshape (no transpose), and the
    # 1x1 conv weight is already in the (Cout, Cin) orientation we need.
    x_cp = x351.reshape(c, p)
    w_mat = conv_w.reshape(c, c)

    # Pack the three tiny per-channel parameter vectors into one (C, 3) array.
    params = jnp.stack(
        [x356.reshape(c), bn_gamma.reshape(c), bn_beta.reshape(c)], axis=1
    ).astype(jnp.float32)

    cost = pl.CostEstimate(
        flops=int(2 * p * c * c),
        transcendentals=int(c),
        bytes_accessed=int(4 * (2 * p * c + c * c + 3 * c)),
    )

    # Total VMEM footprint ~1 MB: far under the limit on every generation, so no
    # tiling of K/P is needed.  The Cout grid exists for v7x dual-TC parallelism
    # and (on 1-TC chips) to overlap the weight DMA / output writeback with compute.
    out_cp = pl.pallas_call(
        fused_scale_conv_bn_kernel,
        out_shape=jax.ShapeDtypeStruct((c, p), jnp.float32),
        grid=(num_blocks,),
        in_specs=[
            pl.BlockSpec((c, 3), lambda i: (0, 0)),    # params: fetched once
            pl.BlockSpec((c, p), lambda i: (0, 0)),    # x:      fetched once
            pl.BlockSpec((blk, c), lambda i: (i, 0)),  # W rows for this Cout block
        ],
        out_specs=pl.BlockSpec((blk, p), lambda i: (i, 0)),
        compiler_params=pltpu.CompilerParams(dimension_semantics=("parallel",)),
        cost_estimate=cost,
    )(params, x_cp, w_mat)

    # (C, P) -> NCHW is again a free reshape for N == 1.
    return out_cp.reshape(n, c, h, w)


def reference(x356, x351, conv_w, bn_gamma, bn_beta):
    x357 = x356 * x351
    wm = conv_w[:, :, 0, 0]  # (Cout, Cin)
    x358 = jnp.einsum("nchw,oc->nohw", x357, wm)
    mean = jnp.mean(x358, axis=(0, 2, 3), keepdims=True)
    var = jnp.mean((x358 - mean) ** 2, axis=(0, 2, 3), keepdims=True)
    xhat = (x358 - mean) / jnp.sqrt(var + EPS)
    return xhat * bn_gamma.reshape(1, -1, 1, 1) + bn_beta.reshape(1, -1, 1, 1)


if __name__ == "__main__":
    key = jax.random.PRNGKey(0)
    k1, k2, k3, k4, k5 = jax.random.split(key, 5)

    N, C, H, W = 1, 336, 14, 14

    x351 = jax.random.normal(k1, (N, C, H, W), dtype=jnp.float32)
    x356 = jax.random.normal(k2, (N, C, 1, 1), dtype=jnp.float32)

    # Deterministic parameter init (shapes from Conv2d(336,336,1,1) / BatchNorm2d(336))
    conv_w = jax.random.normal(k3, (C, C, 1, 1), dtype=jnp.float32) * 0.05
    bn_gamma = 1.0 + 0.1 * jax.random.normal(k4, (C,), dtype=jnp.float32)
    bn_beta = 0.1 * jax.random.normal(k5, (C,), dtype=jnp.float32)

    out = fused_scale_conv_bn(x356, x351, conv_w, bn_gamma, bn_beta)
    out = jax.block_until_ready(out)

    ref = reference(x356, x351, conv_w, bn_gamma, bn_beta)
    assert out.shape == (N, C, H, W), out.shape
    assert jnp.allclose(out, ref, atol=1e-4, rtol=1e-4), float(jnp.max(jnp.abs(out - ref)))

    print("KERNEL_OK")
</pallas_src>

<mosaic_0001>
module attributes {stable_mosaic.version = 11 : i64} {
  func.func @fused_scale_conv_bn_kernel(%arg0: i32, %arg1: memref<336x3xf32, #tpu.memory_space<vmem>>, %arg2: memref<336x196xf32, #tpu.memory_space<vmem>>, %arg3: memref<168x336xf32, #tpu.memory_space<vmem>>, %arg4: memref<168x196xf32, #tpu.memory_space<vmem>>) attributes {dimension_semantics = [#tpu.dimension_semantics<parallel>], iteration_bounds = array<i64: 2>, scalar_prefetch = 0 : i64, scratch_operands = 0 : i64, tpu.core_type = #tpu.core_type<tc>, window_params = [{pipeline_mode = #tpu.pipeline_mode<synchronous>, transform_indices = @transform_0, window_bounds = array<i64: 336, 3>}, {pipeline_mode = #tpu.pipeline_mode<synchronous>, transform_indices = @transform_1, window_bounds = array<i64: 336, 196>}, {transform_indices = @transform_2, window_bounds = array<i64: 168, 336>}, {transform_indices = @transform_3, window_bounds = array<i64: 168, 196>}]} {
    %c0 = arith.constant 0 : index
    %c0_0 = arith.constant 0 : index
    %0 = vector.load %arg1[%c0, %c0_0] : memref<336x3xf32, #tpu.memory_space<vmem>>, vector<336x1xf32>
    %c0_1 = arith.constant 0 : index
    %c0_2 = arith.constant 0 : index
    %1 = vector.load %arg2[%c0_1, %c0_2] : memref<336x196xf32, #tpu.memory_space<vmem>>, vector<336x196xf32>
    %2 = vector.broadcast %0 : vector<336x1xf32> to vector<336x196xf32>
    %3 = arith.mulf %1, %2 : vector<336x196xf32>
    %c0_3 = arith.constant 0 : index
    %c0_4 = arith.constant 0 : index
    %4 = vector.load %arg3[%c0_3, %c0_4] : memref<168x336xf32, #tpu.memory_space<vmem>>, vector<168x336xf32>
    %cst = arith.constant dense<0.000000e+00> : vector<168x196xf32>
    %5 = tpu.matmul %4, %3, %cst {dimension_numbers = #tpu.dot_dimension_numbers<[1], [0], [0], [1], [0, 0, 1, 1], [], []>} : vector<168x336xf32>, vector<336x196xf32>, vector<168x196xf32> -> vector<168x196xf32>
    %c168_i32 = arith.constant 168 : i32
    %6 = arith.muli %arg0, %c168_i32 : i32
    %7 = tpu.assume_multiple %6, 168 : i32
    %8 = arith.index_cast %7 : i32 to index
    %c0_5 = arith.constant 0 : index
    %9 = vector.load %arg1[%8, %c0_5] : memref<336x3xf32, #tpu.memory_space<vmem>>, vector<168x3xf32>
    %10 = vector.extract_strided_slice %9 {offsets = [0, 1], sizes = [168, 1], strides = [1, 1]} : vector<168x3xf32> to vector<168x1xf32>
    %11 = vector.extract_strided_slice %9 {offsets = [0, 2], sizes = [168, 1], strides = [1, 1]} : vector<168x3xf32> to vector<168x1xf32>
    %cst_6 = arith.constant dense<0.000000e+00> : vector<168xf32>
    %12 = vector.multi_reduction <add>, %5, %cst_6 [1] : vector<168x196xf32> to vector<168xf32>
    %13 = vector.shape_cast %12 : vector<168xf32> to vector<168x1xf32>
    %cst_7 = arith.constant 0.00510204071 : f32
    %14 = vector.broadcast %cst_7 : f32 to vector<168x1xf32>
    %15 = arith.mulf %13, %14 : vector<168x1xf32>
    %16 = vector.broadcast %15 : vector<168x1xf32> to vector<168x196xf32>
    %17 = arith.subf %5, %16 : vector<168x196xf32>
    %18 = arith.mulf %17, %17 : vector<168x196xf32>
    %cst_8 = arith.constant dense<0.000000e+00> : vector<168xf32>
    %19 = vector.multi_reduction <add>, %18, %cst_8 [1] : vector<168x196xf32> to vector<168xf32>
    %20 = vector.shape_cast %19 : vector<168xf32> to vector<168x1xf32>
    %cst_9 = arith.constant 0.00510204071 : f32
    %21 = vector.broadcast %cst_9 : f32 to vector<168x1xf32>
    %22 = arith.mulf %20, %21 : vector<168x1xf32>
    %cst_10 = arith.constant 9.99999974E-6 : f32
    %23 = vector.broadcast %cst_10 : f32 to vector<168x1xf32>
    %24 = arith.addf %22, %23 : vector<168x1xf32>
    %25 = math.rsqrt %24 : vector<168x1xf32>
    %26 = arith.mulf %10, %25 : vector<168x1xf32>
    %27 = vector.broadcast %26 : vector<168x1xf32> to vector<168x196xf32>
    %28 = arith.mulf %17, %27 : vector<168x196xf32>
    %29 = vector.broadcast %11 : vector<168x1xf32> to vector<168x196xf32>
    %30 = arith.addf %28, %29 : vector<168x196xf32>
    %c0_11 = arith.constant 0 : index
    %c0_12 = arith.constant 0 : index
    %31 = vector.load %arg4[%c0_11, %c0_12] : memref<168x196xf32, #tpu.memory_space<vmem>>, vector<168x196xf32>
    tpu.vector_store %arg4[%c0_11, %c0_12], %30 {strides = array<i32>} : memref<168x196xf32, #tpu.memory_space<vmem>>, vector<168x196xf32>,
    return
  }
  func.func @transform_0(%arg0: i32) -> (i32, i32) {
    %c0_i32 = arith.constant 0 : i32
    %c0_i32_0 = arith.constant 0 : i32
    %c0_i32_1 = arith.constant 0 : i32
    return %c0_i32, %c0_i32_0 : i32, i32
  }
  func.func @transform_1(%arg0: i32) -> (i32, i32) {
    %c0_i32 = arith.constant 0 : i32
    %c0_i32_0 = arith.constant 0 : i32
    %c0_i32_1 = arith.constant 0 : i32
    return %c0_i32, %c0_i32_0 : i32, i32
  }
  func.func @transform_2(%arg0: i32) -> (i32, i32) {
    %c0_i32 = arith.constant 0 : i32
    %c0_i32_0 = arith.constant 0 : i32
    return %arg0, %c0_i32 : i32, i32
  }
  func.func @transform_3(%arg0: i32) -> (i32, i32) {
    %c0_i32 = arith.constant 0 : i32
    %c0_i32_0 = arith.constant 0 : i32
    return %arg0, %c0_i32 : i32, i32
  }
}

</mosaic_0001>

<bundles_post_ra>
// kernel: tpu_custom_call.1
= control target key start
LH: loop header
LB: loop body
LE: loop exit
PB: predicated region body
PF: predicated region fallthrough
CT: control target
= control target key end

     0   :  { %s2016_s12 = smov 0   ;;  %s3177_s0 = inlined_call_operand.vmem [shape: f32[336,3], index: 0, kind: input, shape index: {}]   ;;  %s3178_s1 = inlined_call_operand.vmem [shape: f32[336,196], index: 1, kind: input, shape index: {}]   ;;  %s3179_s2 = inlined_call_operand.vmem [shape: f32[336,336], index: 2, kind: input, shape index: {}]   ;;  %s3180_s3 = inlined_call_operand.vmem [shape: f32[336,196], index: 3, kind: output, shape index: {}]  }
   0x1 LB: > { %s1885_s13 = sadd.s32 4294967295, %s1990_s12   ;;  %p1889_p0 = scmp.ge.s32.totalorder %s1990_s12, 1  ;;  %s1990_s12 = sphi %s2016_s12, %s13_s12  }
   0x2   : > { %p139_p1 = scmp.lt.s32.totalorder %s1990_s12, 3 }
   0x4   : > { %p140_p2 = pnand %p1889_p0, %p139_p1 }
   0x6   : > { %143 = sbr.rel (%p140_p2) target bundleno = 938 (0x3aa), region = 32 }
   0xb   : > { %v194_v0 = vld [vmem:[%s3177_s0 + $0x78] sm:$0xff]  ;;  %v192_v1 = vld [vmem:[%s3177_s0 + $0x68] sm:$0xff]  ;;  %v1992_v2 = vmov 0   ;;  %v193_v3 = vld [vmem:[%s3177_s0 + $0x70] sm:$0xff]  ;;  %s165_s15 = smul.u32 21, %s1885_s13  ;;  %v1993_v44 = vmov 0.0  }
   0xc   : > { %1931 = vset.pattern.permute.xlu1 %v1992_v2  ;;  %1930 = vset.pattern.permute.xlu0 %v1992_v2  ;;  %v191_v4 = vld [vmem:[%s3177_s0 + $0x60] sm:$0xff]  ;;  %v190_v5 = vld [vmem:[%s3177_s0 + $0x58] sm:$0xff]  ;;  %v189_v6 = vld [vmem:[%s3177_s0 + $0x50] sm:$0xff]  ;;  %s1108_s8 = smul.u32 168, %s1885_s13  ;;  %vm662_vm0 = vcmask 654336   ;;  %vm1131_vm1 = vcmask 556032  }
   0xd   : > { %382 = vperm.xlu0 %1930, %v194_v0   ;;  %372 = vperm.xlu1 %1931, %v192_v1   ;;  %v188_v7 = vld [vmem:[%s3177_s0 + $0x48] sm:$0xff]  ;;  %v187_v8 = vld [vmem:[%s3177_s0 + $0x40] sm:$0xff]  ;;  %v186_v9 = vld [vmem:[%s3177_s0 + $0x38] sm:$0xff]  ;;  %p166_p3 = scmp.lt.s32.totalorder %s165_s15, 41 }
   0xe   : > { %v185_v10 = vld [vmem:[%s3177_s0 + $0x30] sm:$0xff]  ;;  %v184_v11 = vld [vmem:[%s3177_s0 + $0x28] sm:$0xff]  ;;  %v183_v12 = vld [vmem:[%s3177_s0 + $0x20] sm:$0xff]  ;;  %981 = vmatprep.mubr.f32.mxu1 %v1993_v44  ;;  %s2288_s18 = scalar_lea.vmem %s3177_s0, %s1108_s8 }
   0xf   : > { %v182_v13 = vld [vmem:[%s3177_s0 + $0x18] sm:$0xff]  ;;  %v181_v14 = vld [vmem:[%s3177_s0 + $0x10] sm:$0xff]  ;;  %v180_v15 = vld [vmem:[%s3177_s0 + $0x8] sm:$0xff]  ;;  %s3236_s15 = smov (!%p166_p3, %s165_s15), 41 }
  0x10   : > { %v179_v16 = vld [vmem:[%s3177_s0] sm:$0xff]  ;;  %v210_v17 = vld [vmem:[%s3177_s0 + $0xf8] sm:$0xff]  ;;  %v209_v18 = vld [vmem:[%s3177_s0 + $0xf0] sm:$0xff]  ;;  %s1917_s20 = smul.u32 24, %s3236_s15 }
  0x11   : > { %377 = vperm.xlu0 %1930, %v193_v3   ;;  %367 = vperm.xlu1 %1931, %v191_v4   ;;  %v208_v19 = vld [vmem:[%s3177_s0 + $0xe8] sm:$0xff]  ;;  %v207_v20 = vld [vmem:[%s3177_s0 + $0xe0] sm:$0xff]  ;;  %v206_v21 = vld [vmem:[%s3177_s0 + $0xd8] sm:$0xff] }
  0x12   : > { %v205_v22 = vld [vmem:[%s3177_s0 + $0xd0] sm:$0xff]  ;;  %v204_v23 = vld [vmem:[%s3177_s0 + $0xc8] sm:$0xff]  ;;  %v203_v25 = vld [vmem:[%s3177_s0 + $0xc0] sm:$0xff]  ;;  %s2158_s27 = scalar_lea.vmem %s3179_s2, %s1917_s20 }
  0x13   : > { %v220_v24 = vld [vmem:[%s3177_s0 + $0x148] sm:$0xff]  ;;  %v219_v26 = vld [vmem:[%s3177_s0 + $0x140] sm:$0xff]  ;;  %v202_v27 = vld [vmem:[%s3177_s0 + $0xb8] sm:$0xff] }
  0x14   : > { %v218_v28 = vld [vmem:[%s3177_s0 + $0x138] sm:$0xff]  ;;  %v201_v29 = vld [vmem:[%s3177_s0 + $0xb0] sm:$0xff]  ;;  %v200_v31 = vld [vmem:[%s3177_s0 + $0xa8] sm:$0xff] }
  0x15   : > { %362 = vperm.xlu0 %1930, %v190_v5   ;;  %357 = vperm.xlu1 %1931, %v189_v6   ;;  %v217_v30 = vld [vmem:[%s3177_s0 + $0x130] sm:$0xff]  ;;  %v216_v32 = vld [vmem:[%s3177_s0 + $0x128] sm:$0xff]  ;;  %v199_v33 = vld [vmem:[%s3177_s0 + $0xa0] sm:$0xff] }
  0x16   : > { %v215_v34 = vld [vmem:[%s3177_s0 + $0x120] sm:$0xff]  ;;  %v198_v35 = vld [vmem:[%s3177_s0 + $0x98] sm:$0xff]  ;;  %v197_v37 = vld [vmem:[%s3177_s0 + $0x90] sm:$0xff] }
  0x17   : > { %v214_v36 = vld [vmem:[%s3177_s0 + $0x118] sm:$0xff]  ;;  %v213_v38 = vld [vmem:[%s3177_s0 + $0x110] sm:$0xff]  ;;  %v196_v39 = vld [vmem:[%s3177_s0 + $0x88] sm:$0xff] }
  0x18   : > { %v212_v40 = vld [vmem:[%s3177_s0 + $0x108] sm:$0xff]  ;;  %v195_v41 = vld [vmem:[%s3177_s0 + $0x80] sm:$0xff]  ;;  %v252_v45 = vld [vmem:[%s3178_s1 + $0xf8] sm:$0xff] }
  0x19   : > { %352 = vperm.xlu0 %1930, %v188_v7   ;;  %347 = vperm.xlu1 %1931, %v187_v8   ;;  %v211_v42 = vld [vmem:[%s3177_s0 + $0x100] sm:$0xff]  ;;  %v600_v43 = vld [vmem:[%s2158_s27 + $0x8] sm:$0xff]  ;;  %v251_v46 = vld [vmem:[%s3178_s1 + $0xf0] sm:$0xff] }
  0x1a   : > { %790 = vmatprep.mubr.f32.mxu0 %v600_v43  ;;  %v249_v51 = vld [vmem:[%s3178_s1 + $0xe0] sm:$0xff]  ;;  %v250_v52 = vld [vmem:[%s3178_s1 + $0xe8] sm:$0xff]  ;;  %v248_v53 = vld [vmem:[%s3178_s1 + $0xd8] sm:$0xff] }
  0x1b   : > { %v247_v56 = vld [vmem:[%s3178_s1 + $0xd0] sm:$0xff]  ;;  %v246_v59 = vld [vmem:[%s3178_s1 + $0xc8] sm:$0xff]  ;;  %v245_v61 = vld [vmem:[%s3178_s1 + $0xc0] sm:$0xff] }
  0x1c   : > { %v244_v63 = vld [vmem:[%s3178_s1 + $0xb8] sm:$0xff]  ;;  %v243_v3 = vld [vmem:[%s3178_s1 + $0xb0] sm:$0xff]  ;;  %v242_v5 = vld [vmem:[%s3178_s1 + $0xa8] sm:$0xff] }
  0x1d   : > { %342 = vperm.xlu0 %1930, %v186_v9   ;;  %337 = vperm.xlu1 %1931, %v185_v10   ;;  %v241_v7 = vld [vmem:[%s3178_s1 + $0xa0] sm:$0xff]  ;;  %v240_v9 = vld [vmem:[%s3178_s1 + $0x98] sm:$0xff]  ;;  %v227_v43 = vld [vmem:[%s3178_s1 + $0x30] sm:$0xff] }
  0x21   : > { %332 = vperm.xlu0 %1930, %v184_v11   ;;  %327 = vperm.xlu1 %1931, %v183_v12  }
  0x25   : > { %322 = vperm.xlu0 %1930, %v182_v13   ;;  %317 = vperm.xlu1 %1931, %v181_v14   ;;  %v239_v13 = vld [vmem:[%s3178_s1 + $0x90] sm:$0xff] }
  0x29   : > { %312 = vperm.xlu0 %1930, %v180_v15   ;;  %307 = vperm.xlu1 %1931, %v179_v16   ;;  %v238_v15 = vld [vmem:[%s3178_s1 + $0x88] sm:$0xff] }
  0x2d   : > { %462 = vperm.xlu0 %1930, %v210_v17   ;;  %457 = vperm.xlu1 %1931, %v209_v18   ;;  %v237_v17 = vld [vmem:[%s3178_s1 + $0x80] sm:$0xff] }
  0x31   : > { %452 = vperm.xlu0 %1930, %v208_v19   ;;  %447 = vperm.xlu1 %1931, %v207_v20   ;;  %v236_v19 = vld [vmem:[%s3178_s1 + $0x78] sm:$0xff] }
  0x35   : > { %442 = vperm.xlu0 %1930, %v206_v21   ;;  %437 = vperm.xlu1 %1931, %v205_v22  }
  0x39   : > { %432 = vperm.xlu0 %1930, %v204_v23   ;;  %512 = vperm.xlu1 %1931, %v220_v24   ;;  %v235_v23 = vld [vmem:[%s3178_s1 + $0x70] sm:$0xff] }
  0x3d   : > { %427 = vperm.xlu0 %1930, %v203_v25   ;;  %507 = vperm.xlu1 %1931, %v219_v26   ;;  %v234_v25 = vld [vmem:[%s3178_s1 + $0x68] sm:$0xff] }
  0x41   : > { %422 = vperm.xlu0 %1930, %v202_v27   ;;  %502 = vperm.xlu1 %1931, %v218_v28   ;;  %v233_v27 = vld [vmem:[%s3178_s1 + $0x60] sm:$0xff] }
  0x45   : > { %417 = vperm.xlu0 %1930, %v201_v29   ;;  %497 = vperm.xlu1 %1931, %v217_v30   ;;  %v232_v29 = vld [vmem:[%s3178_s1 + $0x58] sm:$0xff] }
  0x49   : > { %412 = vperm.xlu0 %1930, %v200_v31   ;;  %492 = vperm.xlu1 %1931, %v216_v32  }
  0x4d   : > { %407 = vperm.xlu0 %1930, %v199_v33   ;;  %487 = vperm.xlu1 %1931, %v215_v34   ;;  %v231_v33 = vld [vmem:[%s3178_s1 + $0x50] sm:$0xff] }
  0x51   : > { %402 = vperm.xlu0 %1930, %v198_v35   ;;  %482 = vperm.xlu1 %1931, %v214_v36   ;;  %v230_v35 = vld [vmem:[%s3178_s1 + $0x48] sm:$0xff] }
  0x55   : > { %397 = vperm.xlu0 %1930, %v197_v37   ;;  %477 = vperm.xlu1 %1931, %v213_v38   ;;  %v229_v37 = vld [vmem:[%s3178_s1 + $0x40] sm:$0xff] }
  0x59   : > { %392 = vperm.xlu0 %1930, %v196_v39   ;;  %472 = vperm.xlu1 %1931, %v212_v40   ;;  %v228_v39 = vld [vmem:[%s3178_s1 + $0x38] sm:$0xff] }
  0x5d   : > { %387 = vperm.xlu0 %1930, %v195_v41   ;;  %467 = vperm.xlu1 %1931, %v211_v42  }
  0x88   : > { %v383_v47 = vpop.permute.xlu0 %382  ;;  %v373_v48 = vpop.permute.xlu1 %372 }
  0x89   : > { %v546_v49 = vmul.f32 %v383_v47, %v252_v45  ;;  %v545_v50 = vmul.f32 %v383_v47, %v251_v46  ;;  %v542_v60 = vmul.f32 %v373_v48, %v248_v53  ;;  %v541_v62 = vmul.f32 %v373_v48, %v247_v56  ;;  %v226_v46 = vld [vmem:[%s3178_s1 + $0x28] sm:$0xff]  ;;  %v225_v48 = vld [vmem:[%s3178_s1 + $0x20] sm:$0xff] }
  0x8a   : > { %v222_v56 = vld [vmem:[%s3178_s1 + $0x8] sm:$0xff] }
  0x8b   : > { %726 = vmatprep.subr.mxu0 %v546_v49 }
  0x8c   : > { %727 = vmatpush1.msra.mxu0 %v545_v50  ;;  %v378_v54 = vpop.permute.xlu0 %377  ;;  %v368_v55 = vpop.permute.xlu1 %367  ;;  %v224_v50 = vld [vmem:[%s3178_s1 + $0x18] sm:$0xff] }
  0x8d   : > { %v543_v57 = vmul.f32 %v378_v54, %v249_v51  ;;  %v544_v58 = vmul.f32 %v378_v54, %v250_v52  ;;  %v540_v2 = vmul.f32 %v368_v55, %v246_v59  ;;  %v539_v4 = vmul.f32 %v368_v55, %v245_v61  ;;  %v223_v54 = vld [vmem:[%s3178_s1 + $0x10] sm:$0xff] }
  0x8f   : > { %728 = vmatprep.subr.mxu0 %v544_v58  ;;  %v221_v58 = vld [vmem:[%s3178_s1] sm:$0xff] }
  0x90   : > { %729 = vmatpush1.msra.mxu0 %v543_v57  ;;  %v363_v0 = vpop.permute.xlu0 %362  ;;  %v358_v1 = vpop.permute.xlu1 %357 }
  0x91   : > { %730 = vmatprep.subr.mxu0 %v542_v60  ;;  %v538_v6 = vmul.f32 %v363_v0, %v244_v63  ;;  %v537_v8 = vmul.f32 %v363_v0, %v243_v3  ;;  %v536_v12 = vmul.f32 %v358_v1, %v242_v5  ;;  %v535_v14 = vmul.f32 %v358_v1, %v241_v7  ;;  %v284_v60 = vld [vmem:[%s3178_s1 + $0x1f8] sm:$0xff]  ;;  %v283_v0 = vld [vmem:[%s3178_s1 + $0x1f0] sm:$0xff] }
  0x92   : > { %731 = vmatpush1.msra.mxu0 %v541_v62 }
  0x93   : > { %732 = vmatprep.subr.mxu0 %v540_v2  ;;  %v282_v2 = vld [vmem:[%s3178_s1 + $0x1e8] sm:$0xff] }
  0x94   : > { %733 = vmatpush1.msra.mxu0 %v539_v4  ;;  %v353_v10 = vpop.permute.xlu0 %352  ;;  %v348_v11 = vpop.permute.xlu1 %347  ;;  %v281_v4 = vld [vmem:[%s3178_s1 + $0x1e0] sm:$0xff] }
  0x95   : > { %734 = vmatprep.subr.mxu0 %v538_v6  ;;  %v534_v16 = vmul.f32 %v353_v10, %v240_v9  ;;  %v533_v18 = vmul.f32 %v353_v10, %v239_v13  ;;  %v532_v22 = vmul.f32 %v348_v11, %v238_v15  ;;  %v531_v24 = vmul.f32 %v348_v11, %v237_v17  ;;  %v280_v6 = vld [vmem:[%s3178_s1 + $0x1d8] sm:$0xff]  ;;  %v279_v10 = vld [vmem:[%s3178_s1 + $0x1d0] sm:$0xff] }
  0x96   : > { %735 = vmatpush1.msra.mxu0 %v537_v8  ;;  %v3181_v15 = vmov 2   ;;  %v276_v17 = vld [vmem:[%s3178_s1 + $0x1b8] sm:$0xff] }
  0x97   : > { %736 = vmatprep.subr.mxu0 %v536_v12  ;;  %v278_v12 = vld [vmem:[%s3178_s1 + $0x1c8] sm:$0xff]  ;;  %1932 = vset.pattern.permute.xlu1 %v3181_v15 }
  0x98   : > { %737 = vmatpush1.msra.mxu0 %v535_v14  ;;  %v343_v20 = vpop.permute.xlu0 %342  ;;  %v338_v21 = vpop.permute.xlu1 %337  ;;  %v277_v14 = vld [vmem:[%s3178_s1 + $0x1c0] sm:$0xff]  ;;  %1933 = vset.pattern.permute.xlu0 %v3181_v15 }
  0x99   : > { %738 = vmatprep.subr.mxu0 %v534_v16  ;;  %v530_v26 = vmul.f32 %v343_v20, %v236_v19  ;;  %v529_v28 = vmul.f32 %v343_v20, %v235_v23  ;;  %v528_v32 = vmul.f32 %v338_v21, %v234_v25  ;;  %v527_v34 = vmul.f32 %v338_v21, %v233_v27  ;;  %v1110_v20 = vld [vmem:[%s2288_s18] sm:$0xff]  ;;  %v1111_v23 = vld [vmem:[%s2288_s18 + $0x8] sm:$0xff]  ;;  %v303_v27 = vld [vmem:[%s3178_s1 + $0x290] sm:$0xff] }
  0x9a   : > { %739 = vmatpush1.msra.mxu0 %v533_v18  ;;  %v274_v25 = vld [vmem:[%s3178_s1 + $0x1a8] sm:$0xff]  ;;  %1638 = vperm.xlu1 %1932, %v1110_v20  }
  0x9b   : > { %740 = vmatprep.subr.mxu0 %v532_v22  ;;  %v275_v22 = vld [vmem:[%s3178_s1 + $0x1b0] sm:$0xff]  ;;  %1643 = vperm.xlu0 %1933, %v1111_v23   ;;  %v293_v23 = vld [vmem:[%s3178_s1 + $0x240] sm:$0xff] }
  0x9c   : > { %741 = vmatpush1.msra.mxu0 %v531_v24  ;;  %v333_v30 = vpop.permute.xlu0 %332  ;;  %v328_v31 = vpop.permute.xlu1 %327 }
  0x9d   : > { %742 = vmatprep.subr.mxu0 %v530_v26  ;;  %v526_v36 = vmul.f32 %v333_v30, %v232_v29  ;;  %v525_v38 = vmul.f32 %v333_v30, %v231_v33  ;;  %v524_v42 = vmul.f32 %v328_v31, %v230_v35  ;;  %v523_v45 = vmul.f32 %v328_v31, %v229_v37  ;;  %v304_v26 = vld [vmem:[%s3178_s1 + $0x298] sm:$0xff]  ;;  %v273_v29 = vld [vmem:[%s3178_s1 + $0x1a0] sm:$0xff]  ;;  %v1112_v30 = vld [vmem:[%s2288_s18 + $0x10] sm:$0xff] }
  0x9e   : > { %743 = vmatpush1.msra.mxu0 %v529_v28  ;;  %1648 = vperm.xlu1 %1932, %v1112_v30  }
  0x9f   : > { %744 = vmatprep.subr.mxu0 %v528_v32  ;;  %v272_v32 = vld [vmem:[%s3178_s1 + $0x198] sm:$0xff] }
  0xa0   : > { %745 = vmatpush1.msra.mxu0 %v527_v34  ;;  %v323_v40 = vpop.permute.xlu0 %322  ;;  %v318_v41 = vpop.permute.xlu1 %317 }
  0xa1   : > { %746 = vmatprep.subr.mxu0 %v526_v36  ;;  %v522_v47 = vmul.f32 %v323_v40, %v228_v39  ;;  %v521_v49 = vmul.f32 %v323_v40, %v227_v43  ;;  %v520_v53 = vmul.f32 %v318_v41, %v226_v46  ;;  %v519_v55 = vmul.f32 %v318_v41, %v225_v48  ;;  %v271_v36 = vld [vmem:[%s3178_s1 + $0x190] sm:$0xff]  ;;  %v270_v41 = vld [vmem:[%s3178_s1 + $0x188] sm:$0xff]  ;;  %v1113_v46 = vld [vmem:[%s2288_s18 + $0x18] sm:$0xff] }
  0xa2   : > { %747 = vmatpush1.msra.mxu0 %v525_v38  ;;  %v269_v38 = vld [vmem:[%s3178_s1 + $0x180] sm:$0xff]  ;;  %v302_v43 = vld [vmem:[%s3178_s1 + $0x288] sm:$0xff]  ;;  %1653 = vperm.xlu1 %1932, %v1113_v46  }
  0xa3   : > { %748 = vmatprep.subr.mxu0 %v524_v42  ;;  %v301_v42 = vld [vmem:[%s3178_s1 + $0x280] sm:$0xff] }
  0xa4   : > { %749 = vmatpush1.msra.mxu0 %v523_v45  ;;  %v313_v51 = vpop.permute.xlu0 %312  ;;  %v308_v52 = vpop.permute.xlu1 %307 }
  0xa5   : > { %750 = vmatprep.subr.mxu0 %v522_v47  ;;  %v518_v57 = vmul.f32 %v313_v51, %v224_v50  ;;  %v517_v59 = vmul.f32 %v313_v51, %v223_v54  ;;  %v516_v63 = vmul.f32 %v308_v52, %v222_v56  ;;  %v515_v1 = vmul.f32 %v308_v52, %v221_v58  ;;  %v267_v54 = vld [vmem:[%s3178_s1 + $0x170] sm:$0xff] }
  0xa6   : > { %751 = vmatpush1.msra.mxu0 %v521_v49  ;;  %v299_v56 = vld [vmem:[%s3178_s1 + $0x270] sm:$0xff] }
  0xa7   : > { %752 = vmatprep.subr.mxu0 %v520_v53 }
  0xa8   : > { %753 = vmatpush1.msra.mxu0 %v519_v55  ;;  %v463_v61 = vpop.permute.xlu0 %462  ;;  %v458_v62 = vpop.permute.xlu1 %457  ;;  %v268_v55 = vld [vmem:[%s3178_s1 + $0x178] sm:$0xff] }
  0xa9   : > { %754 = vmatprep.subr.mxu0 %v518_v57  ;;  %v578_v3 = vmul.f32 %v463_v61, %v284_v60  ;;  %v577_v5 = vmul.f32 %v463_v61, %v283_v0  ;;  %v576_v9 = vmul.f32 %v458_v62, %v282_v2  ;;  %v575_v11 = vmul.f32 %v458_v62, %v281_v4  ;;  %v300_v57 = vld [vmem:[%s3178_s1 + $0x278] sm:$0xff]  ;;  %v265_v0 = vld [vmem:[%s3178_s1 + $0x160] sm:$0xff] }
  0xaa   : > { %755 = vmatpush1.msra.mxu0 %v517_v59  ;;  %v297_v2 = vld [vmem:[%s3178_s1 + $0x260] sm:$0xff] }
  0xab   : > { %756 = vmatprep.subr.mxu0 %v516_v63 }
  0xac   : > { %v453_v7 = vpop.permute.xlu0 %452  ;;  %757 = vmatpush1.msra.mxu0 %v515_v1  ;;  %v448_v8 = vpop.permute.xlu1 %447  ;;  %v266_v1 = vld [vmem:[%s3178_s1 + $0x168] sm:$0xff] }
  0xad   : > { %758 = vmatprep.subr.mxu0 %v578_v3  ;;  %v574_v13 = vmul.f32 %v453_v7, %v280_v6  ;;  %v573_v16 = vmul.f32 %v453_v7, %v279_v10  ;;  %v572_v21 = vmul.f32 %v448_v8, %v278_v12  ;;  %v571_v24 = vmul.f32 %v448_v8, %v277_v14  ;;  %v298_v3 = vld [vmem:[%s3178_s1 + $0x268] sm:$0xff]  ;;  %v263_v10 = vld [vmem:[%s3178_s1 + $0x150] sm:$0xff] }
  0xae   : > { %759 = vmatpush2.msra.mxu0 %v577_v5  ;;  %v295_v12 = vld [vmem:[%s3178_s1 + $0x250] sm:$0xff] }
  0xaf   : > { %760 = vmatprep.subr.mxu0 %v576_v9 }
  0xb0   : > { %v443_v18 = vpop.permute.xlu0 %442  ;;  %761 = vmatpush2.msra.mxu0 %v575_v11  ;;  %v438_v19 = vpop.permute.xlu1 %437  ;;  %v264_v11 = vld [vmem:[%s3178_s1 + $0x158] sm:$0xff] }
  0xb1   : > { %762 = vmatprep.subr.mxu0 %v574_v13  ;;  %v570_v28 = vmul.f32 %v443_v18, %v276_v17  ;;  %v569_v31 = vmul.f32 %v443_v18, %v275_v22  ;;  %v568_v35 = vmul.f32 %v438_v19, %v274_v25  ;;  %v567_v40 = vmul.f32 %v438_v19, %v273_v29  ;;  %v296_v13 = vld [vmem:[%s3178_s1 + $0x258] sm:$0xff]  ;;  %v262_v22 = vld [vmem:[%s3178_s1 + $0x148] sm:$0xff] }
  0xb2   : > { %763 = vmatpush2.msra.mxu0 %v573_v16 }
  0xb3   : > { %764 = vmatprep.subr.mxu0 %v572_v21  ;;  %v261_v21 = vld [vmem:[%s3178_s1 + $0x140] sm:$0xff] }
  0xb4   : > { %v433_v33 = vpop.permute.xlu0 %432  ;;  %765 = vmatpush2.msra.mxu0 %v571_v24  ;;  %v513_v34 = vpop.permute.xlu1 %512  ;;  %v294_v24 = vld [vmem:[%s3178_s1 + $0x248] sm:$0xff] }
  0xb5   : > { %766 = vmatprep.subr.mxu0 %v570_v28  ;;  %v598_v37 = vmul.f32 %v513_v34, %v304_v26  ;;  %v597_v39 = vmul.f32 %v513_v34, %v303_v27  ;;  %v566_v45 = vmul.f32 %v433_v33, %v272_v32  ;;  %v565_v47 = vmul.f32 %v433_v33, %v271_v36  ;;  %v260_v32 = vld [vmem:[%s3178_s1 + $0x138] sm:$0xff]  ;;  %v291_v33 = vld [vmem:[%s3178_s1 + $0x230] sm:$0xff] }
  0xb6   : > { %767 = vmatpush2.msra.mxu0 %v569_v31  ;;  %v259_v31 = vld [vmem:[%s3178_s1 + $0x130] sm:$0xff]  ;;  %v292_v34 = vld [vmem:[%s3178_s1 + $0x238] sm:$0xff] }
  0xb7   : > { %768 = vmatprep.subr.mxu0 %v568_v35  ;;  %929 = vmatprep.subr.mxu1 %v598_v37 }
  0xb8   : > { %v428_v48 = vpop.permute.xlu0 %427  ;;  %769 = vmatpush2.msra.mxu0 %v567_v40  ;;  %930 = vmatpush1.msra.mxu1 %v597_v39  ;;  %v508_v49 = vpop.permute.xlu1 %507 }
  0xb9   : > { %v563_v50 = vmul.f32 %v428_v48, %v269_v38  ;;  %v564_v51 = vmul.f32 %v428_v48, %v270_v41  ;;  %v595_v52 = vmul.f32 %v508_v49, %v301_v42  ;;  %v596_v53 = vmul.f32 %v508_v49, %v302_v43  ;;  %770 = vmatprep.subr.mxu0 %v566_v45  ;;  %v257_v41 = vld [vmem:[%s3178_s1 + $0x120] sm:$0xff]  ;;  %v258_v42 = vld [vmem:[%s3178_s1 + $0x128] sm:$0xff] }
  0xba   : > { %771 = vmatpush2.msra.mxu0 %v565_v47  ;;  %v289_v43 = vld [vmem:[%s3178_s1 + $0x220] sm:$0xff]  ;;  %v290_v45 = vld [vmem:[%s3178_s1 + $0x228] sm:$0xff] }
  0xbb   : > { %772 = vmatprep.subr.mxu0 %v564_v51  ;;  %931 = vmatprep.subr.mxu1 %v596_v53  ;;  %v256_v53 = vld [vmem:[%s3178_s1 + $0x118] sm:$0xff] }
  0xbc   : > { %v423_v58 = vpop.permute.xlu0 %422  ;;  %773 = vmatpush2.msra.mxu0 %v563_v50  ;;  %932 = vmatpush1.msra.mxu1 %v595_v52  ;;  %v503_v59 = vpop.permute.xlu1 %502  ;;  %v255_v52 = vld [vmem:[%s3178_s1 + $0x110] sm:$0xff] }
  0xbd   : > { %v561_v60 = vmul.f32 %v423_v58, %v267_v54  ;;  %v562_v61 = vmul.f32 %v423_v58, %v268_v55  ;;  %v593_v62 = vmul.f32 %v503_v59, %v299_v56  ;;  %v594_v63 = vmul.f32 %v503_v59, %v300_v57  ;;  %v287_v54 = vld [vmem:[%s3178_s1 + $0x210] sm:$0xff]  ;;  %v288_v55 = vld [vmem:[%s3178_s1 + $0x218] sm:$0xff] }
  0xbf   : > { %774 = vmatprep.subr.mxu0 %v562_v61  ;;  %933 = vmatprep.subr.mxu1 %v594_v63  ;;  %v254_v63 = vld [vmem:[%s3178_s1 + $0x108] sm:$0xff] }
  0xc0   : > { %v418_v4 = vpop.permute.xlu0 %417  ;;  %775 = vmatpush2.msra.mxu0 %v561_v60  ;;  %934 = vmatpush1.msra.mxu1 %v593_v62  ;;  %v498_v5 = vpop.permute.xlu1 %497  ;;  %v253_v62 = vld [vmem:[%s3178_s1 + $0x100] sm:$0xff] }
  0xc1   : > { %v559_v6 = vmul.f32 %v418_v4, %v265_v0  ;;  %v560_v7 = vmul.f32 %v418_v4, %v266_v1  ;;  %v591_v8 = vmul.f32 %v498_v5, %v297_v2  ;;  %v592_v9 = vmul.f32 %v498_v5, %v298_v3  ;;  %v285_v0 = vld [vmem:[%s3178_s1 + $0x200] sm:$0xff]  ;;  %v286_v1 = vld [vmem:[%s3178_s1 + $0x208] sm:$0xff] }
  0xc3   : > { %776 = vmatprep.subr.mxu0 %v560_v7  ;;  %935 = vmatprep.subr.mxu1 %v592_v9  ;;  %v601_v9 = vld [vmem:[%s2158_s27 + $0x10] sm:$0xff] }
  0xc4   : > { %v413_v14 = vpop.permute.xlu0 %412  ;;  %777 = vmatpush2.msra.mxu0 %v559_v6  ;;  %936 = vmatpush1.msra.mxu1 %v591_v8  ;;  %v493_v16 = vpop.permute.xlu1 %492  ;;  %v599_v8 = vld [vmem:[%s2158_s27] sm:$0xff] }
  0xc5   : > { %v557_v17 = vmul.f32 %v413_v14, %v263_v10  ;;  %v558_v18 = vmul.f32 %v413_v14, %v264_v11  ;;  %v589_v19 = vmul.f32 %v493_v16, %v295_v12  ;;  %v590_v20 = vmul.f32 %v493_v16, %v296_v13  ;;  %v603_v10 = vld [vmem:[%s2158_s27 + $0x20] sm:$0xff]  ;;  %v602_v11 = vld [vmem:[%s2158_s27 + $0x18] sm:$0xff]  ;;  %v604_v12 = vld [vmem:[%s2158_s27 + $0x28] sm:$0xff] }
  0xc6   : > { %v606_v13 = vld [vmem:[%s2158_s27 + $0x38] sm:$0xff]  ;;  %v605_v14 = vld [vmem:[%s2158_s27 + $0x30] sm:$0xff]  ;;  %v607_v16 = vld [vmem:[%s2158_s27 + $0x40] sm:$0xff] }
  0xc7   : > { %778 = vmatprep.subr.mxu0 %v558_v18  ;;  %937 = vmatprep.subr.mxu1 %v590_v20  ;;  %v608_v18 = vld [vmem:[%s2158_s27 + $0x48] sm:$0xff] }
  0xc8   : > { %v408_v25 = vpop.permute.xlu0 %407  ;;  %779 = vmatpush2.msra.mxu0 %v557_v17  ;;  %938 = vmatpush1.msra.mxu1 %v589_v19  ;;  %v488_v26 = vpop.permute.xlu1 %487  ;;  %v609_v17 = vld [vmem:[%s2158_s27 + $0x50] sm:$0xff]  ;;  %v610_v19 = vld [vmem:[%s2158_s27 + $0x58] sm:$0xff]  ;;  %v612_v20 = vld [vmem:[%s2158_s27 + $0x68] sm:$0xff] }
  0xc9   : > { %v555_v27 = vmul.f32 %v408_v25, %v261_v21  ;;  %v556_v28 = vmul.f32 %v408_v25, %v262_v22  ;;  %v587_v29 = vmul.f32 %v488_v26, %v293_v23  ;;  %v588_v30 = vmul.f32 %v488_v26, %v294_v24  ;;  %v611_v21 = vld [vmem:[%s2158_s27 + $0x60] sm:$0xff]  ;;  %v613_v22 = vld [vmem:[%s2158_s27 + $0x70] sm:$0xff]  ;;  %v614_v24 = vld [vmem:[%s2158_s27 + $0x78] sm:$0xff] }
  0xca   : > { %v615_v23 = vld [vmem:[%s2158_s27 + $0x80] sm:$0xff]  ;;  %v616_v25 = vld [vmem:[%s2158_s27 + $0x88] sm:$0xff]  ;;  %v618_v26 = vld [vmem:[%s2158_s27 + $0x98] sm:$0xff] }
  0xcb   : > { %780 = vmatprep.subr.mxu0 %v556_v28  ;;  %939 = vmatprep.subr.mxu1 %v588_v30  ;;  %v619_v28 = vld [vmem:[%s2158_s27 + $0xa0] sm:$0xff]  ;;  %v620_v30 = vld [vmem:[%s2158_s27 + $0xa8] sm:$0xff] }
  0xcc   : > { %v403_v35 = vpop.permute.xlu0 %402  ;;  %781 = vmatpush2.msra.mxu0 %v555_v27  ;;  %940 = vmatpush1.msra.mxu1 %v587_v29  ;;  %v483_v36 = vpop.permute.xlu1 %482  ;;  %v617_v27 = vld [vmem:[%s2158_s27 + $0x90] sm:$0xff] }
  0xcd   : > { %v553_v37 = vmul.f32 %v403_v35, %v259_v31  ;;  %v554_v38 = vmul.f32 %v403_v35, %v260_v32  ;;  %v585_v39 = vmul.f32 %v483_v36, %v291_v33  ;;  %v586_v40 = vmul.f32 %v483_v36, %v292_v34  ;;  %v621_v29 = vld [vmem:[%s2158_s27 + $0xb0] sm:$0xff]  ;;  %v622_v31 = vld [vmem:[%s2158_s27 + $0xb8] sm:$0xff]  ;;  %v624_v32 = vld [vmem:[%s2158_s27 + $0xc8] sm:$0xff] }
  0xce   : > { %v623_v33 = vld [vmem:[%s2158_s27 + $0xc0] sm:$0xff]  ;;  %v625_v34 = vld [vmem:[%s2158_s27 + $0xd0] sm:$0xff]  ;;  %v626_v36 = vld [vmem:[%s2158_s27 + $0xd8] sm:$0xff] }
  0xcf   : > { %782 = vmatprep.subr.mxu0 %v554_v38  ;;  %941 = vmatprep.subr.mxu1 %v586_v40  ;;  %v627_v35 = vld [vmem:[%s2158_s27 + $0xe0] sm:$0xff]  ;;  %v630_v38 = vld [vmem:[%s2158_s27 + $0xf8] sm:$0xff] }
  0xd0   : > { %v398_v46 = vpop.permute.xlu0 %397  ;;  %783 = vmatpush2.msra.mxu0 %v553_v37  ;;  %942 = vmatpush1.msra.mxu1 %v585_v39  ;;  %v478_v47 = vpop.permute.xlu1 %477  ;;  %v628_v37 = vld [vmem:[%s2158_s27 + $0xe8] sm:$0xff]  ;;  %v629_v39 = vld [vmem:[%s2158_s27 + $0xf0] sm:$0xff]  ;;  %v631_v40 = vld [vmem:[%s2158_s27 + $0x100] sm:$0xff] }
  0xd1   : > { %v551_v48 = vmul.f32 %v398_v46, %v257_v41  ;;  %v552_v49 = vmul.f32 %v398_v46, %v258_v42  ;;  %v583_v50 = vmul.f32 %v478_v47, %v289_v43  ;;  %v584_v51 = vmul.f32 %v478_v47, %v290_v45  ;;  %v633_v41 = vld [vmem:[%s2158_s27 + $0x110] sm:$0xff]  ;;  %v632_v42 = vld [vmem:[%s2158_s27 + $0x108] sm:$0xff]  ;;  %v634_v43 = vld [vmem:[%s2158_s27 + $0x118] sm:$0xff] }
  0xd2   : > { %v636_v45 = vld [vmem:[%s2158_s27 + $0x128] sm:$0xff]  ;;  %v635_v46 = vld [vmem:[%s2158_s27 + $0x120] sm:$0xff]  ;;  %v637_v47 = vld [vmem:[%s2158_s27 + $0x130] sm:$0xff] }
  0xd3   : > { %784 = vmatprep.subr.mxu0 %v552_v49  ;;  %943 = vmatprep.subr.mxu1 %v584_v51  ;;  %v638_v49 = vld [vmem:[%s2158_s27 + $0x138] sm:$0xff] }
  0xd4   : > { %v393_v56 = vpop.permute.xlu0 %392  ;;  %785 = vmatpush2.msra.mxu0 %v551_v48  ;;  %944 = vmatpush1.msra.mxu1 %v583_v50  ;;  %v473_v57 = vpop.permute.xlu1 %472  ;;  %v639_v48 = vld [vmem:[%s2158_s27 + $0x140] sm:$0xff]  ;;  %v640_v50 = vld [vmem:[%s2158_s27 + $0x148] sm:$0xff]  ;;  %v642_v51 = vld [vmem:[%s2158_s27 + $0x158] sm:$0xff] }
  0xd5   : > { %v549_v58 = vmul.f32 %v393_v56, %v255_v52  ;;  %v550_v59 = vmul.f32 %v393_v56, %v256_v53  ;;  %v581_v60 = vmul.f32 %v473_v57, %v287_v54  ;;  %v582_v61 = vmul.f32 %v473_v57, %v288_v55  ;;  %v641_v52 = vld [vmem:[%s2158_s27 + $0x150] sm:$0xff]  ;;  %v643_v53 = vld [vmem:[%s2158_s27 + $0x160] sm:$0xff]  ;;  %v644_v55 = vld [vmem:[%s2158_s27 + $0x168] sm:$0xff] }
  0xd6   : > { %v645_v54 = vld [vmem:[%s2158_s27 + $0x170] sm:$0xff]  ;;  %v646_v56 = vld [vmem:[%s2158_s27 + $0x178] sm:$0xff]  ;;  %v648_v57 = vld [vmem:[%s2158_s27 + $0x188] sm:$0xff] }
  0xd7   : > { %786 = vmatprep.subr.mxu0 %v550_v59  ;;  %945 = vmatprep.subr.mxu1 %v582_v61  ;;  %v649_v59 = vld [vmem:[%s2158_s27 + $0x190] sm:$0xff]  ;;  %v650_v61 = vld [vmem:[%s2158_s27 + $0x198] sm:$0xff] }
  0xd8   : > { %v388_v2 = vpop.permute.xlu0 %387  ;;  %787 = vmatpush2.msra.mxu0 %v549_v58  ;;  %946 = vmatpush1.msra.mxu1 %v581_v60  ;;  %v468_v3 = vpop.permute.xlu1 %467  ;;  %v647_v58 = vld [vmem:[%s2158_s27 + $0x180] sm:$0xff] }
  0xd9   : > { %v547_v4 = vmul.f32 %v388_v2, %v253_v62  ;;  %v548_v5 = vmul.f32 %v388_v2, %v254_v63  ;;  %v579_v6 = vmul.f32 %v468_v3, %v285_v0  ;;  %v580_v7 = vmul.f32 %v468_v3, %v286_v1  ;;  %v651_v60 = vld [vmem:[%s2158_s27 + $0x1a0] sm:$0xff]  ;;  %v652_v62 = vld [vmem:[%s2158_s27 + $0x1a8] sm:$0xff]  ;;  %v654_v63 = vld [vmem:[%s2158_s27 + $0x1b8] sm:$0xff] }
  0xda   : > { %v653_v0 = vld [vmem:[%s2158_s27 + $0x1b0] sm:$0xff]  ;;  %v655_v1 = vld [vmem:[%s2158_s27 + $0x1c0] sm:$0xff]  ;;  %v656_v3 = vld [vmem:[%s2158_s27 + $0x1c8] sm:$0xff] }
  0xdb   : > { %788 = vmatprep.subr.mxu0 %v548_v5  ;;  %947 = vmatprep.subr.mxu1 %v580_v7  ;;  %v657_v2 = vld [vmem:[%s2158_s27 + $0x1d0] sm:$0xff]  ;;  %v660_v5 = vld [vmem:[%s2158_s27 + $0x1e8] sm:$0xff] }
  0xdc   : > { %789 = vmatpush2.msra.mxu0 %v547_v4  ;;  %948 = vmatpush1.msra.mxu1 %v579_v6  ;;  %v658_v4 = vld [vmem:[%s2158_s27 + $0x1d8] sm:$0xff]  ;;  %v659_v6 = vld [vmem:[%s2158_s27 + $0x1e0] sm:$0xff]  ;;  %v661_v7 = vld [vmem:[%s2158_s27 + $0x1f0] sm:$0xff]  ;;  %s1916_s27 = sshll.u32 %s3236_s15, 4 }
  0xdd   : > { %791 = vmatmul.mubr.f32.vlgmr.msra.gmra.mxu0 %v599_v8  ;;  %1893 = vmatmul.mubr.msk.f32.vlgmr.msra.gmra.mxu1 %vm662_vm0, %v601_v9  ;;  %s3033_s14 = scalar_lea.vmem %s3180_s3, %s1916_s27 }
  0xde   : > { %796 = vmatprep.mubr.f32.mxu0 %v603_v10  ;;  %987 = vmatprep.mubr.f32.mxu1 %v1993_v44 }
  0xe1   : > { %797 = vmatmul.mubr.f32.gmra.mxu0 %v602_v11  ;;  %1894 = vmatmul.mubr.msk.f32.gmra.mxu1 %vm662_vm0, %v604_v12 }
  0xe2   : > { %802 = vmatprep.mubr.f32.mxu0 %v606_v13  ;;  %993 = vmatprep.mubr.f32.mxu1 %v1993_v44 }
  0xe5   : > { %803 = vmatmul.mubr.f32.gmra.mxu0 %v605_v14  ;;  %1895 = vmatmul.mubr.msk.f32.gmra.mxu1 %vm662_vm0, %v607_v16 }
  0xe6   : > { %808 = vmatprep.mubr.f32.mxu0 %v609_v17  ;;  %999 = vmatprep.mubr.f32.mxu1 %v1993_v44 }
  0xe9   : > { %809 = vmatmul.mubr.f32.gmra.mxu0 %v608_v18  ;;  %1896 = vmatmul.mubr.msk.f32.gmra.mxu1 %vm662_vm0, %v610_v19 }
  0xea   : > { %814 = vmatprep.mubr.f32.mxu0 %v612_v20  ;;  %1005 = vmatprep.mubr.f32.mxu1 %v1993_v44 }
  0xed   : > { %815 = vmatmul.mubr.f32.gmra.mxu0 %v611_v21  ;;  %1897 = vmatmul.mubr.msk.f32.gmra.mxu1 %vm662_vm0, %v613_v22 }
  0xee   : > { %820 = vmatprep.mubr.f32.mxu0 %v615_v23  ;;  %1011 = vmatprep.mubr.f32.mxu1 %v1993_v44 }
  0xf1   : > { %821 = vmatmul.mubr.f32.gmra.mxu0 %v614_v24  ;;  %1898 = vmatmul.mubr.msk.f32.gmra.mxu1 %vm662_vm0, %v616_v25 }
  0xf2   : > { %826 = vmatprep.mubr.f32.mxu0 %v618_v26  ;;  %1017 = vmatprep.mubr.f32.mxu1 %v1993_v44 }
  0xf5   : > { %827 = vmatmul.mubr.f32.gmra.mxu0 %v617_v27  ;;  %1899 = vmatmul.mubr.msk.f32.gmra.mxu1 %vm662_vm0, %v619_v28 }
  0xf6   : > { %832 = vmatprep.mubr.f32.mxu0 %v621_v29  ;;  %1023 = vmatprep.mubr.f32.mxu1 %v1993_v44 }
  0xf9   : > { %833 = vmatmul.mubr.f32.gmra.mxu0 %v620_v30  ;;  %1900 = vmatmul.mubr.msk.f32.gmra.mxu1 %vm662_vm0, %v622_v31 }
  0xfa   : > { %838 = vmatprep.mubr.f32.mxu0 %v624_v32  ;;  %1029 = vmatprep.mubr.f32.mxu1 %v1993_v44 }
  0xfd   : > { %839 = vmatmul.mubr.f32.gmra.mxu0 %v623_v33  ;;  %1901 = vmatmul.mubr.msk.f32.gmra.mxu1 %vm662_vm0, %v625_v34 }
  0xfe   : > { %844 = vmatprep.mubr.f32.mxu0 %v627_v35  ;;  %1035 = vmatprep.mubr.f32.mxu1 %v1993_v44 }
 0x101   : > { %845 = vmatmul.mubr.f32.gmra.mxu0 %v626_v36  ;;  %1902 = vmatmul.mubr.msk.f32.gmra.mxu1 %vm662_vm0, %v628_v37 }
 0x102   : > { %850 = vmatprep.mubr.f32.mxu0 %v630_v38  ;;  %1041 = vmatprep.mubr.f32.mxu1 %v1993_v44 }
 0x105   : > { %851 = vmatmul.mubr.f32.gmra.mxu0 %v629_v39  ;;  %1903 = vmatmul.mubr.msk.f32.gmra.mxu1 %vm662_vm0, %v631_v40 }
 0x106   : > { %856 = vmatprep.mubr.f32.mxu0 %v633_v41  ;;  %1047 = vmatprep.mubr.f32.mxu1 %v1993_v44 }
 0x109   : > { %857 = vmatmul.mubr.f32.gmra.mxu0 %v632_v42  ;;  %1904 = vmatmul.mubr.msk.f32.gmra.mxu1 %vm662_vm0, %v634_v43 }
 0x10a   : > { %862 = vmatprep.mubr.f32.mxu0 %v636_v45  ;;  %1053 = vmatprep.mubr.f32.mxu1 %v1993_v44 }
 0x10d   : > { %863 = vmatmul.mubr.f32.gmra.mxu0 %v635_v46  ;;  %1905 = vmatmul.mubr.msk.f32.gmra.mxu1 %vm662_vm0, %v637_v47 }
 0x10e   : > { %868 = vmatprep.mubr.f32.mxu0 %v639_v48  ;;  %1059 = vmatprep.mubr.f32.mxu1 %v1993_v44 }
 0x111   : > { %869 = vmatmul.mubr.f32.gmra.mxu0 %v638_v49  ;;  %1906 = vmatmul.mubr.msk.f32.gmra.mxu1 %vm662_vm0, %v640_v50 }
 0x112   : > { %874 = vmatprep.mubr.f32.mxu0 %v642_v51  ;;  %1065 = vmatprep.mubr.f32.mxu1 %v1993_v44 }
 0x115   : > { %875 = vmatmul.mubr.f32.gmra.mxu0 %v641_v52  ;;  %1907 = vmatmul.mubr.msk.f32.gmra.mxu1 %vm662_vm0, %v643_v53 }
 0x116   : > { %880 = vmatprep.mubr.f32.mxu0 %v645_v54  ;;  %1071 = vmatprep.mubr.f32.mxu1 %v1993_v44 }
 0x119   : > { %881 = vmatmul.mubr.f32.gmra.mxu0 %v644_v55  ;;  %1908 = vmatmul.mubr.msk.f32.gmra.mxu1 %vm662_vm0, %v646_v56 }
 0x11a   : > { %886 = vmatprep.mubr.f32.mxu0 %v648_v57  ;;  %1077 = vmatprep.mubr.f32.mxu1 %v1993_v44 }
 0x11d   : > { %887 = vmatmul.mubr.f32.gmra.mxu0 %v647_v58  ;;  %1909 = vmatmul.mubr.msk.f32.gmra.mxu1 %vm662_vm0, %v649_v59 }
 0x11e   : > { %892 = vmatprep.mubr.f32.mxu0 %v651_v60  ;;  %1083 = vmatprep.mubr.f32.mxu1 %v1993_v44 }
 0x121   : > { %893 = vmatmul.mubr.f32.gmra.mxu0 %v650_v61  ;;  %1910 = vmatmul.mubr.msk.f32.gmra.mxu1 %vm662_vm0, %v652_v62 }
 0x122   : > { %898 = vmatprep.mubr.f32.mxu0 %v654_v63  ;;  %1089 = vmatprep.mubr.f32.mxu1 %v1993_v44 }
 0x125   : > { %899 = vmatmul.mubr.f32.gmra.mxu0 %v653_v0  ;;  %1911 = vmatmul.mubr.msk.f32.gmra.mxu1 %vm662_vm0, %v655_v1 }
 0x126   : > { %904 = vmatprep.mubr.f32.mxu0 %v657_v2  ;;  %1095 = vmatprep.mubr.f32.mxu1 %v1993_v44 }
 0x129   : > { %905 = vmatmul.mubr.f32.gmra.mxu0 %v656_v3  ;;  %1912 = vmatmul.mubr.msk.f32.gmra.mxu1 %vm662_vm0, %v658_v4 }
 0x12a   : > { %910 = vmatprep.mubr.f32.mxu0 %v660_v5  ;;  %1101 = vmatprep.mubr.f32.mxu1 %v1993_v44 }
 0x12d   : > { %911 = vmatmul.mubr.f32.gmra.mxu0 %v659_v6  ;;  %1913 = vmatmul.mubr.msk.f32.gmra.mxu1 %vm662_vm0, %v661_v7 }
 0x19d   : > { %v792_v8 = vpop.f32.mrf.mxu0  ;;  %v983_v9 = vpop.f32.mrf.mxu1 }
 0x19e   : > { %v2532_v13 = vadd.f32 %v983_v9, %v792_v8 }
 0x19f   : > { %v794_v10 = vpop.f32.mrf.mxu0  ;;  %v985_v11 = vpop.f32.mrf.mxu1 }
 0x1a0   : > { %v2530_v12 = vadd.f32 %v985_v11, %v794_v10 }
 0x1a1   : > { %v798_v14 = vpop.f32.mrf.mxu0  ;;  %v989_v16 = vpop.f32.mrf.mxu1 }
 0x1a2   : > { %v1132_v17 = vsel %vm1131_vm1, %v2530_v12, 0.0  ;;  %v2539_v21 = vadd.f32 %v989_v16, %v798_v14 }
 0x1a3   : > { %v800_v44 = vpop.f32.mrf.mxu0  ;;  %v991_v18 = vpop.f32.mrf.mxu1  ;;  %v1133_v19 = vadd.f32 %v1132_v17, %v2532_v13 }
 0x1a4   : > { %v2537_v20 = vadd.f32 %v991_v18, %v800_v44 }
 0x1a5   : > { %v995_v22 = vpop.f32.mrf.mxu1  ;;  %1134 = vadd.xlane.f32.xlu0 %v1133_v19  ;;  %v804_v23 = vpop.f32.mrf.mxu0 }
 0x1a6   : > { %v1136_v24 = vsel %vm1131_vm1, %v2537_v20, 0.0  ;;  %v2546_v29 = vadd.f32 %v995_v22, %v804_v23 }
 0x1a7   : > { %v806_v25 = vpop.f32.mrf.mxu0  ;;  %v997_v26 = vpop.f32.mrf.mxu1  ;;  %v1137_v27 = vadd.f32 %v1136_v24, %v2539_v21 }
 0x1a8   : > { %v2544_v28 = vadd.f32 %v997_v26, %v806_v25 }
 0x1a9   : > { %v1001_v30 = vpop.f32.mrf.mxu1  ;;  %1138 = vadd.xlane.f32.xlu1 %v1137_v27  ;;  %v810_v31 = vpop.f32.mrf.mxu0 }
 0x1aa   : > { %v1140_v32 = vsel %vm1131_vm1, %v2544_v28, 0.0  ;;  %v2553_v37 = vadd.f32 %v1001_v30, %v810_v31 }
 0x1ab   : > { %v812_v33 = vpop.f32.mrf.mxu0  ;;  %v1003_v34 = vpop.f32.mrf.mxu1  ;;  %v1141_v35 = vadd.f32 %v1140_v32, %v2546_v29 }
 0x1ac   : > { %v2551_v36 = vadd.f32 %v1003_v34, %v812_v33 }
 0x1ad   : > { %v1007_v38 = vpop.f32.mrf.mxu1  ;;  %1142 = vadd.xlane.f32.xlu0 %v1141_v35  ;;  %v816_v39 = vpop.f32.mrf.mxu0 }
 0x1ae   : > { %v1144_v40 = vsel %vm1131_vm1, %v2551_v36, 0.0  ;;  %v2560_v46 = vadd.f32 %v1007_v38, %v816_v39 }
 0x1af   : > { %v818_v41 = vpop.f32.mrf.mxu0  ;;  %v1009_v42 = vpop.f32.mrf.mxu1  ;;  %v1145_v43 = vadd.f32 %v1144_v40, %v2553_v37 }
 0x1b0   : > { %v2558_v45 = vadd.f32 %v1009_v42, %v818_v41 }
 0x1b1   : > { %v1013_v47 = vpop.f32.mrf.mxu1  ;;  %1146 = vadd.xlane.f32.xlu0 %v1145_v43  ;;  %v822_v48 = vpop.f32.mrf.mxu0 }
 0x1b2   : > { %v1148_v49 = vsel %vm1131_vm1, %v2558_v45, 0.0  ;;  %v2567_v54 = vadd.f32 %v1013_v47, %v822_v48 }
 0x1b3   : > { %v824_v50 = vpop.f32.mrf.mxu0  ;;  %v1015_v51 = vpop.f32.mrf.mxu1  ;;  %v1149_v52 = vadd.f32 %v1148_v49, %v2560_v46 }
 0x1b4   : > { %v2565_v53 = vadd.f32 %v1015_v51, %v824_v50 }
 0x1b5   : > { %v1019_v55 = vpop.f32.mrf.mxu1  ;;  %1150 = vadd.xlane.f32.xlu1 %v1149_v52  ;;  %v828_v56 = vpop.f32.mrf.mxu0 }
 0x1b6   : > { %v1152_v57 = vsel %vm1131_vm1, %v2565_v53, 0.0  ;;  %v2574_v62 = vadd.f32 %v1019_v55, %v828_v56 }
 0x1b7   : > { %v830_v58 = vpop.f32.mrf.mxu0  ;;  %v1021_v59 = vpop.f32.mrf.mxu1  ;;  %v1153_v60 = vadd.f32 %v1152_v57, %v2567_v54 }
 0x1b8   : > { %v2572_v61 = vadd.f32 %v1021_v59, %v830_v58 }
 0x1b9   : > { %v1025_v63 = vpop.f32.mrf.mxu1  ;;  %1154 = vadd.xlane.f32.xlu0 %v1153_v60  ;;  %v834_v0 = vpop.f32.mrf.mxu0 }
 0x1ba   : > { %v1156_v1 = vsel %vm1131_vm1, %v2572_v61, 0.0  ;;  %v2581_v6 = vadd.f32 %v1025_v63, %v834_v0 }
 0x1bb   : > { %v836_v2 = vpop.f32.mrf.mxu0  ;;  %v1027_v3 = vpop.f32.mrf.mxu1  ;;  %v1157_v4 = vadd.f32 %v1156_v1, %v2574_v62 }
 0x1bc   : > { %v2579_v5 = vadd.f32 %v1027_v3, %v836_v2 }
 0x1bd   : > { %v1031_v7 = vpop.f32.mrf.mxu1  ;;  %1158 = vadd.xlane.f32.xlu1 %v1157_v4  ;;  %v840_v8 = vpop.f32.mrf.mxu0 }
 0x1be   : > { %v1160_v9 = vsel %vm1131_vm1, %v2579_v5, 0.0  ;;  %v2588_v17 = vadd.f32 %v1031_v7, %v840_v8 }
 0x1bf   : > { %v842_v10 = vpop.f32.mrf.mxu0  ;;  %v1033_v11 = vpop.f32.mrf.mxu1  ;;  %v1161_v14 = vadd.f32 %v1160_v9, %v2581_v6 }
 0x1c0   : > { %v2586_v16 = vadd.f32 %v1033_v11, %v842_v10 }
 0x1c1   : > { %v1037_v44 = vpop.f32.mrf.mxu1  ;;  %1162 = vadd.xlane.f32.xlu0 %v1161_v14  ;;  %v846_v18 = vpop.f32.mrf.mxu0 }
 0x1c2   : > { %v1164_v19 = vsel %vm1131_vm1, %v2586_v16, 0.0  ;;  %v2595_v26 = vadd.f32 %v1037_v44, %v846_v18 }
 0x1c3   : > { %v848_v22 = vpop.f32.mrf.mxu0  ;;  %v1039_v23 = vpop.f32.mrf.mxu1  ;;  %v1165_v24 = vadd.f32 %v1164_v19, %v2588_v17 }
 0x1c4   : > { %v2593_v25 = vadd.f32 %v1039_v23, %v848_v22 }
 0x1c5   : > { %v1043_v27 = vpop.f32.mrf.mxu1  ;;  %1166 = vadd.xlane.f32.xlu1 %v1165_v24  ;;  %v852_v30 = vpop.f32.mrf.mxu0 }
 0x1c6   : > { %v1168_v31 = vsel %vm1131_vm1, %v2593_v25, 0.0  ;;  %v2602_v38 = vadd.f32 %v1043_v27, %v852_v30 }
 0x1c7   : > { %v854_v32 = vpop.f32.mrf.mxu0  ;;  %v1045_v33 = vpop.f32.mrf.mxu1  ;;  %v1169_v34 = vadd.f32 %v1168_v31, %v2595_v26 }
 0x1c8   : > { %v2600_v35 = vadd.f32 %v1045_v33, %v854_v32 }
 0x1c9   : > { %v1049_v39 = vpop.f32.mrf.mxu1  ;;  %1170 = vadd.xlane.f32.xlu0 %v1169_v34  ;;  %v858_v40 = vpop.f32.mrf.mxu0 }
 0x1ca   : > { %v1172_v41 = vsel %vm1131_vm1, %v2600_v35, 0.0  ;;  %v2609_v49 = vadd.f32 %v1049_v39, %v858_v40 }
 0x1cb   : > { %v860_v42 = vpop.f32.mrf.mxu0  ;;  %v1051_v43 = vpop.f32.mrf.mxu1  ;;  %v1173_v47 = vadd.f32 %v1172_v41, %v2602_v38 }
 0x1cc   : > { %v2607_v48 = vadd.f32 %v1051_v43, %v860_v42 }
 0x1cd   : > { %v1055_v50 = vpop.f32.mrf.mxu1  ;;  %1174 = vadd.xlane.f32.xlu1 %v1173_v47  ;;  %v864_v51 = vpop.f32.mrf.mxu0 }
 0x1ce   : > { %v1176_v52 = vsel %vm1131_vm1, %v2607_v48, 0.0  ;;  %v2616_v59 = vadd.f32 %v1055_v50, %v864_v51 }
 0x1cf   : > { %v866_v55 = vpop.f32.mrf.mxu0  ;;  %v1057_v56 = vpop.f32.mrf.mxu1  ;;  %v1177_v57 = vadd.f32 %v1176_v52, %v2609_v49 }
 0x1d0   : > { %v2614_v58 = vadd.f32 %v1057_v56, %v866_v55 }
 0x1d1   : > { %v1061_v60 = vpop.f32.mrf.mxu1  ;;  %1178 = vadd.xlane.f32.xlu0 %v1177_v57  ;;  %v870_v63 = vpop.f32.mrf.mxu0 }
 0x1d2   : > { %v1180_v0 = vsel %vm1131_vm1, %v2614_v58, 0.0  ;;  %v2623_v7 = vadd.f32 %v1061_v60, %v870_v63 }
 0x1d3   : > { %v872_v1 = vpop.f32.mrf.mxu0  ;;  %v1063_v2 = vpop.f32.mrf.mxu1  ;;  %v1181_v3 = vadd.f32 %v1180_v0, %v2616_v59 }
 0x1d4   : > { %v2621_v4 = vadd.f32 %v1063_v2, %v872_v1 }
 0x1d5   : > { %v1067_v8 = vpop.f32.mrf.mxu1  ;;  %1182 = vadd.xlane.f32.xlu1 %v1181_v3  ;;  %v876_v9 = vpop.f32.mrf.mxu0 }
 0x1d6   : > { %v1184_v10 = vsel %vm1131_vm1, %v2621_v4, 0.0  ;;  %v2630_v19 = vadd.f32 %v1067_v8, %v876_v9 }
 0x1d7   : > { %v878_v11 = vpop.f32.mrf.mxu0  ;;  %v1069_v14 = vpop.f32.mrf.mxu1  ;;  %v1185_v44 = vadd.f32 %v1184_v10, %v2623_v7 }
 0x1d8   : > { %v2628_v18 = vadd.f32 %v1069_v14, %v878_v11 }
 0x1d9   : > { %v1073_v22 = vpop.f32.mrf.mxu1  ;;  %1186 = vadd.xlane.f32.xlu0 %v1185_v44  ;;  %v882_v23 = vpop.f32.mrf.mxu0 }
 0x1da   : > { %v1188_v24 = vsel %vm1131_vm1, %v2628_v18, 0.0  ;;  %v2637_v33 = vadd.f32 %v1073_v22, %v882_v23 }
 0x1db   : > { %v884_v27 = vpop.f32.mrf.mxu0  ;;  %v1075_v30 = vpop.f32.mrf.mxu1  ;;  %v1189_v31 = vadd.f32 %v1188_v24, %v2630_v19 }
 0x1dc   : > { %v2635_v32 = vadd.f32 %v1075_v30, %v884_v27 }
 0x1dd   : > { %v1079_v34 = vpop.f32.mrf.mxu1  ;;  %1190 = vadd.xlane.f32.xlu1 %v1189_v31  ;;  %v888_v39 = vpop.f32.mrf.mxu0 }
 0x1de   : > { %v1192_v40 = vsel %vm1131_vm1, %v2635_v32, 0.0  ;;  %v2644_v50 = vadd.f32 %v1079_v34, %v888_v39 }
 0x1df   : > { %v890_v41 = vpop.f32.mrf.mxu0  ;;  %v1081_v42 = vpop.f32.mrf.mxu1  ;;  %v1193_v43 = vadd.f32 %v1192_v40, %v2637_v33 }
 0x1e0   : > { %v2642_v47 = vadd.f32 %v1081_v42, %v890_v41 }
 0x1e1   : > { %v1085_v51 = vpop.f32.mrf.mxu1  ;;  %1194 = vadd.xlane.f32.xlu0 %v1193_v43  ;;  %v894_v52 = vpop.f32.mrf.mxu0 }
 0x1e2   : > { %v1196_v55 = vsel %vm1131_vm1, %v2642_v47, 0.0  ;;  %v2651_v0 = vadd.f32 %v1085_v51, %v894_v52 }
 0x1e3   : > { %v896_v56 = vpop.f32.mrf.mxu0  ;;  %v1087_v57 = vpop.f32.mrf.mxu1  ;;  %v1197_v60 = vadd.f32 %v1196_v55, %v2644_v50 }
 0x1e4   : > { %v2649_v63 = vadd.f32 %v1087_v57, %v896_v56 }
 0x1e5   : > { %v1091_v1 = vpop.f32.mrf.mxu1  ;;  %1198 = vadd.xlane.f32.xlu1 %v1197_v60  ;;  %v900_v2 = vpop.f32.mrf.mxu0  ;;  %v2678_v60 = vld [vmem:[%s2288_s18 + $0x28] sm:$0xff] }
 0x1e6   : > { %v1200_v3 = vsel %vm1131_vm1, %v2649_v63, 0.0  ;;  %v2658_v14 = vadd.f32 %v1091_v1, %v900_v2  ;;  %v2681_v1 = vld [vmem:[%s2288_s18 + $0x20] sm:$0xff]  ;;  %v2685_v2 = vpop.permute.xlu1 %1638 }
 0x1e7   : > { %v902_v8 = vpop.f32.mrf.mxu0  ;;  %v1093_v9 = vpop.f32.mrf.mxu1  ;;  %v1201_v10 = vadd.f32 %v1200_v3, %v2651_v0 }
 0x1e8   : > { %v2656_v11 = vadd.f32 %v1093_v9, %v902_v8  ;;  %v2689_v8 = vpop.permute.xlu0 %1643 }
 0x1e9   : > { %v1097_v44 = vpop.f32.mrf.mxu1  ;;  %1202 = vadd.xlane.f32.xlu0 %v1201_v10  ;;  %v906_v22 = vpop.f32.mrf.mxu0 }
 0x1ea   : > { %v1204_v23 = vsel %vm1131_vm1, %v2656_v11, 0.0  ;;  %v2665_v34 = vadd.f32 %v1097_v44, %v906_v22  ;;  %v2687_v3 = vpop.permute.xlu1 %1648 }
 0x1eb   : > { %v908_v24 = vpop.f32.mrf.mxu0  ;;  %v1099_v27 = vpop.f32.mrf.mxu1  ;;  %v1205_v30 = vadd.f32 %v1204_v23, %v2658_v14 }
 0x1ec   : > { %v2663_v31 = vadd.f32 %v1099_v27, %v908_v24 }
 0x1ed   : > { %v1103_v39 = vpop.f32.mrf.mxu1  ;;  %1206 = vadd.xlane.f32.xlu1 %v1205_v30  ;;  %v912_v40 = vpop.f32.mrf.mxu0 }
 0x1ee   : > { %v1208_v41 = vsel %vm1131_vm1, %v2663_v31, 0.0  ;;  %v2672_v55 = vadd.f32 %v1103_v39, %v912_v40  ;;  %v2691_v9 = vpop.permute.xlu1 %1653 }
 0x1ef   : > { %v914_v42 = vpop.f32.mrf.mxu0  ;;  %v1105_v43 = vpop.f32.mrf.mxu1  ;;  %v1209_v51 = vadd.f32 %v1208_v41, %v2665_v34 }
 0x1f0   : > { %v2670_v52 = vadd.f32 %v1105_v43, %v914_v42 }
 0x1f1   : > { %1210 = vadd.xlane.f32.xlu0 %v1209_v51 }
 0x1f2   : > { %v1212_v56 = vsel %vm1131_vm1, %v2670_v52, 0.0 }
 0x1f3   : > { %v1213_v57 = vadd.f32 %v1212_v56, %v2672_v55 }
 0x1f5   : > { %1214 = vadd.xlane.f32.xlu1 %v1213_v57 }
 0x206   : > { %1663 = vperm.xlu1 %1932, %v2678_v60  }
 0x207   : > { %1658 = vperm.xlu0 %1933, %v2681_v1  }
 0x22e   : > { %v1135_v10 = vpop.xlane.xlu0 %1134 }
 0x22f   : > { %v1216_v44 = vmul.f32 0.0051020407, %v1135_v10 }
 0x231   : > { %v2694_v22 = vsub.f32 %v2532_v13, %v1216_v44  ;;  %v2697_v23 = vsub.f32 %v2530_v12, %v1216_v44 }
 0x232   : > { %v1139_v24 = vpop.xlane.xlu1 %1138 }
 0x233   : > { %v1217_v27 = vmul.f32 0.0051020407, %v1139_v24  ;;  %v1279_v30 = vmul.f32 %v2694_v22, %v2694_v22  ;;  %v1280_v39 = vmul.f32 %v2697_v23, %v2697_v23 }
 0x235   : > { %v2704_v40 = vsub.f32 %v2539_v21, %v1217_v27  ;;  %v2707_v41 = vsub.f32 %v2537_v20, %v1217_v27  ;;  %v1321_v13 = vsel %vm1131_vm1, %v1280_v39, 0.0 }
 0x236   : > { %v1143_v42 = vpop.xlane.xlu0 %1142  ;;  %v1322_v43 = vadd.f32 %v1321_v13, %v1279_v30 }
 0x237   : > { %v1218_v12 = vmul.f32 0.0051020407, %v1143_v42  ;;  %v1281_v51 = vmul.f32 %v2704_v40, %v2704_v40  ;;  %v1282_v56 = vmul.f32 %v2707_v41, %v2707_v41 }
 0x238   : > { %1323 = vadd.xlane.f32.xlu0 %v1322_v43 }
 0x239   : > { %v2715_v57 = vsub.f32 %v2546_v29, %v1218_v12  ;;  %v2718_v21 = vsub.f32 %v2544_v28, %v1218_v12  ;;  %v1325_v20 = vsel %vm1131_vm1, %v1282_v56, 0.0 }
 0x23a   : > { %v1147_v10 = vpop.xlane.xlu0 %1146  ;;  %v1326_v44 = vadd.f32 %v1325_v20, %v1281_v51 }
 0x23b   : > { %v1219_v24 = vmul.f32 0.0051020407, %v1147_v10  ;;  %v1283_v27 = vmul.f32 %v2715_v57, %v2715_v57  ;;  %v1284_v30 = vmul.f32 %v2718_v21, %v2718_v21 }
 0x23c   : > { %1327 = vadd.xlane.f32.xlu1 %v1326_v44 }
 0x23d   : > { %v2726_v39 = vsub.f32 %v2553_v37, %v1219_v24  ;;  %v2729_v29 = vsub.f32 %v2551_v36, %v1219_v24  ;;  %v1329_v28 = vsel %vm1131_vm1, %v1284_v30, 0.0 }
 0x23e   : > { %v1151_v13 = vpop.xlane.xlu1 %1150  ;;  %v1330_v42 = vadd.f32 %v1329_v28, %v1283_v27 }
 0x23f   : > { %v1220_v43 = vmul.f32 0.0051020407, %v1151_v13  ;;  %v1285_v12 = vmul.f32 %v2726_v39, %v2726_v39  ;;  %v1286_v51 = vmul.f32 %v2729_v29, %v2729_v29 }
 0x240   : > { %1331 = vadd.xlane.f32.xlu0 %v1330_v42 }
 0x241   : > { %v2737_v56 = vsub.f32 %v2560_v46, %v1220_v43  ;;  %v2740_v37 = vsub.f32 %v2558_v45, %v1220_v43  ;;  %v1333_v36 = vsel %vm1131_vm1, %v1286_v51, 0.0 }
 0x242   : > { %v1155_v20 = vpop.xlane.xlu0 %1154  ;;  %v1334_v10 = vadd.f32 %v1333_v36, %v1285_v12 }
 0x243   : > { %v1221_v44 = vmul.f32 0.0051020407, %v1155_v20  ;;  %v1287_v24 = vmul.f32 %v2737_v56, %v2737_v56  ;;  %v1288_v27 = vmul.f32 %v2740_v37, %v2740_v37 }
 0x244   : > { %1335 = vadd.xlane.f32.xlu1 %v1334_v10 }
 0x245   : > { %v2748_v30 = vsub.f32 %v2567_v54, %v1221_v44  ;;  %v2751_v46 = vsub.f32 %v2565_v53, %v1221_v44  ;;  %v1337_v45 = vsel %vm1131_vm1, %v1288_v27, 0.0 }
 0x246   : > { %v1159_v28 = vpop.xlane.xlu1 %1158  ;;  %v1338_v13 = vadd.f32 %v1337_v45, %v1287_v24 }
 0x247   : > { %v1222_v42 = vmul.f32 0.0051020407, %v1159_v28  ;;  %v1289_v43 = vmul.f32 %v2748_v30, %v2748_v30  ;;  %v1290_v12 = vmul.f32 %v2751_v46, %v2751_v46 }
 0x248   : > { %1339 = vadd.xlane.f32.xlu0 %v1338_v13 }
 0x249   : > { %v2759_v51 = vsub.f32 %v2574_v62, %v1222_v42  ;;  %v2762_v54 = vsub.f32 %v2572_v61, %v1222_v42  ;;  %v1341_v53 = vsel %vm1131_vm1, %v1290_v12, 0.0 }
 0x24a   : > { %v1163_v36 = vpop.xlane.xlu0 %1162  ;;  %v1342_v20 = vadd.f32 %v1341_v53, %v1289_v43 }
 0x24b   : > { %v1223_v10 = vmul.f32 0.0051020407, %v1163_v36  ;;  %v1291_v44 = vmul.f32 %v2759_v51, %v2759_v51  ;;  %v1292_v24 = vmul.f32 %v2762_v54, %v2762_v54 }
 0x24c   : > { %1343 = vadd.xlane.f32.xlu1 %v1342_v20 }
 0x24d   : > { %v2770_v27 = vsub.f32 %v2581_v6, %v1223_v10  ;;  %v2773_v62 = vsub.f32 %v2579_v5, %v1223_v10  ;;  %v1345_v61 = vsel %vm1131_vm1, %v1292_v24, 0.0 }
 0x24e   : > { %v1167_v45 = vpop.xlane.xlu1 %1166  ;;  %v1346_v28 = vadd.f32 %v1345_v61, %v1291_v44 }
 0x24f   : > { %v1224_v13 = vmul.f32 0.0051020407, %v1167_v45  ;;  %v1293_v42 = vmul.f32 %v2770_v27, %v2770_v27  ;;  %v1294_v43 = vmul.f32 %v2773_v62, %v2773_v62 }
 0x250   : > { %1347 = vadd.xlane.f32.xlu0 %v1346_v28 }
 0x251   : > { %v2781_v12 = vsub.f32 %v2588_v17, %v1224_v13  ;;  %v2784_v6 = vsub.f32 %v2586_v16, %v1224_v13  ;;  %v1349_v5 = vsel %vm1131_vm1, %v1294_v43, 0.0 }
 0x252   : > { %v1171_v53 = vpop.xlane.xlu0 %1170  ;;  %v1350_v36 = vadd.f32 %v1349_v5, %v1293_v42 }
 0x253   : > { %v1225_v20 = vmul.f32 0.0051020407, %v1171_v53  ;;  %v1295_v10 = vmul.f32 %v2781_v12, %v2781_v12  ;;  %v1296_v44 = vmul.f32 %v2784_v6, %v2784_v6 }
 0x254   : > { %1351 = vadd.xlane.f32.xlu1 %v1350_v36 }
 0x255   : > { %v2792_v24 = vsub.f32 %v2595_v26, %v1225_v20  ;;  %v2795_v17 = vsub.f32 %v2593_v25, %v1225_v20  ;;  %v1353_v16 = vsel %vm1131_vm1, %v1296_v44, 0.0 }
 0x256   : > { %v1175_v61 = vpop.xlane.xlu1 %1174  ;;  %v1354_v45 = vadd.f32 %v1353_v16, %v1295_v10 }
 0x257   : > { %v1226_v28 = vmul.f32 0.0051020407, %v1175_v61  ;;  %v1297_v13 = vmul.f32 %v2792_v24, %v2792_v24  ;;  %v1298_v42 = vmul.f32 %v2795_v17, %v2795_v17 }
 0x258   : > { %1355 = vadd.xlane.f32.xlu0 %v1354_v45 }
 0x259   : > { %v2803_v43 = vsub.f32 %v2602_v38, %v1226_v28  ;;  %v2806_v26 = vsub.f32 %v2600_v35, %v1226_v28  ;;  %v1357_v25 = vsel %vm1131_vm1, %v1298_v42, 0.0 }
 0x25a   : > { %v1179_v5 = vpop.xlane.xlu0 %1178  ;;  %v1358_v53 = vadd.f32 %v1357_v25, %v1297_v13 }
 0x25b   : > { %v1227_v36 = vmul.f32 0.0051020407, %v1179_v5  ;;  %v1299_v20 = vmul.f32 %v2803_v43, %v2803_v43  ;;  %v1300_v10 = vmul.f32 %v2806_v26, %v2806_v26 }
 0x25c   : > { %1359 = vadd.xlane.f32.xlu1 %v1358_v53 }
 0x25d   : > { %v2814_v44 = vsub.f32 %v2609_v49, %v1227_v36  ;;  %v2817_v38 = vsub.f32 %v2607_v48, %v1227_v36  ;;  %v1361_v35 = vsel %vm1131_vm1, %v1300_v10, 0.0 }
 0x25e   : > { %v1183_v16 = vpop.xlane.xlu1 %1182  ;;  %v1362_v61 = vadd.f32 %v1361_v35, %v1299_v20 }
 0x25f   : > { %v1228_v45 = vmul.f32 0.0051020407, %v1183_v16  ;;  %v1301_v28 = vmul.f32 %v2814_v44, %v2814_v44  ;;  %v1302_v13 = vmul.f32 %v2817_v38, %v2817_v38 }
 0x260   : > { %1363 = vadd.xlane.f32.xlu0 %v1362_v61 }
 0x261   : > { %v2825_v42 = vsub.f32 %v2616_v59, %v1228_v45  ;;  %v2828_v49 = vsub.f32 %v2614_v58, %v1228_v45  ;;  %v1365_v48 = vsel %vm1131_vm1, %v1302_v13, 0.0 }
 0x262   : > { %v1187_v25 = vpop.xlane.xlu0 %1186  ;;  %v1366_v5 = vadd.f32 %v1365_v48, %v1301_v28 }
 0x263   : > { %3200 = vst [vmem:[#allocation2_spill] sm:$0xff] %v2828_v49  ;;  %v1229_v53 = vmul.f32 0.0051020407, %v1187_v25  ;;  %v1303_v36 = vmul.f32 %v2825_v42, %v2825_v42  ;;  %v1304_v20 = vmul.f32 %v2828_v49, %v2828_v49 }
 0x264   : > { %1367 = vadd.xlane.f32.xlu1 %v1366_v5 }
 0x265   : > { %v2836_v10 = vsub.f32 %v2623_v7, %v1229_v53  ;;  %v2839_v59 = vsub.f32 %v2621_v4, %v1229_v53  ;;  %v1369_v58 = vsel %vm1131_vm1, %v1304_v20, 0.0 }
 0x266   : > { %v1191_v35 = vpop.xlane.xlu1 %1190  ;;  %v1370_v16 = vadd.f32 %v1369_v58, %v1303_v36 }
 0x267   : > { %3201 = vst [vmem:[#allocation3_spill] sm:$0xff] %v2836_v10  ;;  %3202 = vst [vmem:[#allocation4_spill] sm:$0xff] %v2839_v59  ;;  %v1230_v61 = vmul.f32 0.0051020407, %v1191_v35  ;;  %v1305_v45 = vmul.f32 %v2836_v10, %v2836_v10  ;;  %v1306_v28 = vmul.f32 %v2839_v59, %v2839_v59 }
 0x268   : > { %1371 = vadd.xlane.f32.xlu0 %v1370_v16 }
 0x269   : > { %v2847_v13 = vsub.f32 %v2630_v19, %v1230_v61  ;;  %v2850_v7 = vsub.f32 %v2628_v18, %v1230_v61  ;;  %v1373_v4 = vsel %vm1131_vm1, %v1306_v28, 0.0 }
 0x26a   : > { %v1195_v48 = vpop.xlane.xlu0 %1194  ;;  %v1374_v25 = vadd.f32 %v1373_v4, %v1305_v45 }
 0x26b   : > { %3203 = vst [vmem:[#allocation5_spill] sm:$0xff] %v2847_v13  ;;  %3204 = vst [vmem:[#allocation6_spill] sm:$0xff] %v2850_v7  ;;  %v1231_v5 = vmul.f32 0.0051020407, %v1195_v48  ;;  %v1307_v53 = vmul.f32 %v2847_v13, %v2847_v13  ;;  %v1308_v36 = vmul.f32 %v2850_v7, %v2850_v7 }
 0x26c   : > { %1375 = vadd.xlane.f32.xlu1 %v1374_v25 }
 0x26d   : > { %v2858_v20 = vsub.f32 %v2637_v33, %v1231_v5  ;;  %v2861_v19 = vsub.f32 %v2635_v32, %v1231_v5  ;;  %v1377_v18 = vsel %vm1131_vm1, %v1308_v36, 0.0 }
 0x26e   : > { %v1199_v58 = vpop.xlane.xlu1 %1198  ;;  %v1378_v35 = vadd.f32 %v1377_v18, %v1307_v53 }
 0x26f   : > { %3205 = vst [vmem:[#allocation7_spill] sm:$0xff] %v2858_v20  ;;  %3206 = vst [vmem:[#allocation8_spill] sm:$0xff] %v2861_v19  ;;  %v1232_v16 = vmul.f32 0.0051020407, %v1199_v58  ;;  %v1309_v61 = vmul.f32 %v2858_v20, %v2858_v20  ;;  %v1310_v45 = vmul.f32 %v2861_v19, %v2861_v19 }
 0x270   : > { %1379 = vadd.xlane.f32.xlu0 %v1378_v35 }
 0x271   : > { %v2869_v28 = vsub.f32 %v2644_v50, %v1232_v16  ;;  %v2872_v33 = vsub.f32 %v2642_v47, %v1232_v16  ;;  %v1381_v32 = vsel %vm1131_vm1, %v1310_v45, 0.0 }
 0x272   : > { %v1203_v4 = vpop.xlane.xlu0 %1202  ;;  %v1382_v48 = vadd.f32 %v1381_v32, %v1309_v61 }
 0x273   : > { %3207 = vst [vmem:[#allocation9_spill] sm:$0xff] %v2869_v28  ;;  %3208 = vst [vmem:[#allocation10_spill] sm:$0xff] %v2872_v33  ;;  %v1233_v25 = vmul.f32 0.0051020407, %v1203_v4  ;;  %v1311_v5 = vmul.f32 %v2869_v28, %v2869_v28  ;;  %v1312_v53 = vmul.f32 %v2872_v33, %v2872_v33 }
 0x274   : > { %1383 = vadd.xlane.f32.xlu1 %v1382_v48 }
 0x275   : > { %v2880_v36 = vsub.f32 %v2651_v0, %v1233_v25  ;;  %v2883_v50 = vsub.f32 %v2649_v63, %v1233_v25  ;;  %v1385_v47 = vsel %vm1131_vm1, %v1312_v53, 0.0 }
 0x276   : > { %v1207_v18 = vpop.xlane.xlu1 %1206  ;;  %v1386_v58 = vadd.f32 %v1385_v47, %v1311_v5 }
 0x277   : > { %3209 = vst [vmem:[#allocation11_spill] sm:$0xff] %v2880_v36  ;;  %3210 = vst [vmem:[#allocation12_spill] sm:$0xff] %v2883_v50  ;;  %v1234_v35 = vmul.f32 0.0051020407, %v1207_v18  ;;  %v1313_v16 = vmul.f32 %v2880_v36, %v2880_v36  ;;  %v1314_v61 = vmul.f32 %v2883_v50, %v2883_v50 }
 0x278   : > { %1387 = vadd.xlane.f32.xlu0 %v1386_v58 }
 0x279   : > { %v2891_v45 = vsub.f32 %v2658_v14, %v1234_v35  ;;  %v2894_v0 = vsub.f32 %v2656_v11, %v1234_v35  ;;  %v1389_v63 = vsel %vm1131_vm1, %v1314_v61, 0.0 }
 0x27a   : > { %v1211_v32 = vpop.xlane.xlu0 %1210  ;;  %v1390_v4 = vadd.f32 %v1389_v63, %v1313_v16 }
 0x27b   : > { %3211 = vst [vmem:[#allocation13_spill] sm:$0xff] %v2891_v45  ;;  %3212 = vst [vmem:[#allocation14_spill] sm:$0xff] %v2894_v0  ;;  %v1235_v48 = vmul.f32 0.0051020407, %v1211_v32  ;;  %v1315_v25 = vmul.f32 %v2891_v45, %v2891_v45  ;;  %v1316_v5 = vmul.f32 %v2894_v0, %v2894_v0 }
 0x27c   : > { %1391 = vadd.xlane.f32.xlu1 %v1390_v4 }
 0x27d   : > { %v2902_v53 = vsub.f32 %v2665_v34, %v1235_v48  ;;  %v2905_v14 = vsub.f32 %v2663_v31, %v1235_v48  ;;  %v1393_v11 = vsel %vm1131_vm1, %v1316_v5, 0.0  ;;  %v2933_v5 = vld [vmem:[%s2288_s18 + $0x58] sm:$0xff] }
 0x27e   : > { %v1215_v47 = vpop.xlane.xlu1 %1214  ;;  %v1394_v18 = vadd.f32 %v1393_v11, %v1315_v25  ;;  %v2929_v25 = vld [vmem:[%s2288_s18 + $0x48] sm:$0xff]  ;;  %v2936_v11 = vld [vmem:[%s2288_s18 + $0x30] sm:$0xff] }
 0x27f   : > { %3213 = vst [vmem:[#allocation15_spill] sm:$0xff] %v2902_v53  ;;  %3214 = vst [vmem:[#allocation16_spill] sm:$0xff] %v2905_v14  ;;  %v1236_v58 = vmul.f32 0.0051020407, %v1215_v47  ;;  %v1317_v35 = vmul.f32 %v2902_v53, %v2902_v53  ;;  %v1318_v16 = vmul.f32 %v2905_v14, %v2905_v14  ;;  %v2941_v47 = vld [vmem:[%s2288_s18 + $0x68] sm:$0xff] }
 0x280   : > { %1395 = vadd.xlane.f32.xlu0 %v1394_v18  ;;  %v2944_v18 = vld [vmem:[%s2288_s18 + $0x40] sm:$0xff] }
 0x281   : > { %v2913_v34 = vsub.f32 %v2672_v55, %v1236_v58  ;;  %v2916_v31 = vsub.f32 %v2670_v52, %v1236_v58  ;;  %v1397_v61 = vsel %vm1131_vm1, %v1318_v16, 0.0  ;;  %v2925_v52 = vld [vmem:[%s2288_s18 + $0x38] sm:$0xff]  ;;  %v2957_v16 = vld [vmem:[%s2288_s18 + $0x88] sm:$0xff] }
 0x282   : > { %v1398_v63 = vadd.f32 %v1397_v61, %v1317_v35  ;;  %v2949_v58 = vld [vmem:[%s2288_s18 + $0x78] sm:$0xff]  ;;  %v2952_v35 = vld [vmem:[%s2288_s18 + $0x50] sm:$0xff]  ;;  %v2960_v61 = vld [vmem:[%s2288_s18 + $0x60] sm:$0xff]  ;;  %v2978_v15 = vpop.permute.xlu1 %1663 }
 0x283   : > { %3215 = vst [vmem:[#allocation17_spill] sm:$0xff] %v2913_v34  ;;  %3216 = vst [vmem:[#allocation18_spill] sm:$0xff] %v2916_v31  ;;  %v1319_v32 = vmul.f32 %v2913_v34, %v2913_v34  ;;  %v1320_v4 = vmul.f32 %v2916_v31, %v2916_v31 }
 0x284   : > { %1399 = vadd.xlane.f32.xlu1 %v1398_v63  ;;  %v2965_v63 = vld [vmem:[%s2288_s18 + $0x70] sm:$0xff] }
 0x285   : > { %v1401_v48 = vsel %vm1131_vm1, %v1320_v4, 0.0  ;;  %v2969_v4 = vld [vmem:[%s2288_s18 + $0x80] sm:$0xff] }
 0x286   : > { %v1402_v55 = vadd.f32 %v1401_v48, %v1319_v32  ;;  %v1995_v32 = vmov 1   ;;  %v2973_v48 = vld [vmem:[%s2288_s18 + $0x90] sm:$0xff] }
 0x288   : > { %1403 = vadd.xlane.f32.xlu0 %v1402_v55  ;;  %v2976_v55 = vpop.permute.xlu0 %1658 }
 0x295   : > { %1673 = vperm.xlu1 %1932, %v2925_v52  }
 0x299   : > { %1683 = vperm.xlu1 %1932, %v2929_v25  }
 0x29d   : > { %1693 = vperm.xlu1 %1932, %v2933_v5  }
 0x29e   : > { %1668 = vperm.xlu0 %1933, %v2936_v11  }
 0x2a1   : > { %1703 = vperm.xlu1 %1932, %v2941_v47  }
 0x2a2   : > { %1678 = vperm.xlu0 %1933, %v2944_v18  }
 0x2a5   : > { %1713 = vperm.xlu1 %1932, %v2949_v58  }
 0x2a6   : > { %1688 = vperm.xlu0 %1933, %v2952_v35  }
 0x2a9   : > { %1723 = vperm.xlu1 %1932, %v2957_v16  }
 0x2aa   : > { %1698 = vperm.xlu0 %1933, %v2960_v61  }
 0x2ad   : > { %1934 = vset.pattern.permute.xlu1 %v1995_v32 }
 0x2ae   : > { %1708 = vperm.xlu0 %1933, %v2965_v63  }
 0x2b2   : > { %1718 = vperm.xlu0 %1933, %v2969_v4  }
 0x2b6   : > { %1728 = vperm.xlu0 %1933, %v2973_v48  }
 0x2ba   : > { %1935 = vset.pattern.permute.xlu0 %v1995_v32 }
 0x2c1   : > { %v1324_v31 = vpop.xlane.xlu0 %1323 }
 0x2c2   : > { %v1405_v34 = vmul.f32 0.0051020407, %v1324_v31 }
 0x2c4   : > { %v1426_v14 = vadd.f32 1e-05, %v1405_v34  ;;  %v1980_v34 = vld [vmem:[%s2288_s18] sm:$0xff] }
 0x2c5   : > { %v1328_v53 = vpop.xlane.xlu1 %1327 }
 0x2c6   : > { %1938 = vrsqrt.f32 %v1426_v14  ;;  %v1406_v0 = vmul.f32 0.0051020407, %v1328_v53 }
 0x2c8   : > { %v1427_v45 = vadd.f32 1e-05, %v1406_v0 }
 0x2c9   : > { %v1332_v50 = vpop.xlane.xlu0 %1331 }
 0x2ca   : > { %1940 = vrsqrt.f32 %v1427_v45  ;;  %v1407_v36 = vmul.f32 0.0051020407, %v1332_v50 }
 0x2cc   : > { %v1428_v33 = vadd.f32 1e-05, %v1407_v36  ;;  %v1981_v36 = vld [vmem:[%s2288_s18 + $0x8] sm:$0xff] }
 0x2cd   : > { %v1336_v28 = vpop.xlane.xlu1 %1335 }
 0x2ce   : > { %1942 = vrsqrt.f32 %v1428_v33  ;;  %v1408_v32 = vmul.f32 0.0051020407, %v1336_v28 }
 0x2d0   : > { %v1429_v19 = vadd.f32 1e-05, %v1408_v32  ;;  %v1982_v32 = vld [vmem:[%s2288_s18 + $0x10] sm:$0xff] }
 0x2d1   : > { %v1340_v20 = vpop.xlane.xlu0 %1339 }
 0x2d2   : > { %1944 = vrsqrt.f32 %v1429_v19  ;;  %v1409_v7 = vmul.f32 0.0051020407, %v1340_v20 }
 0x2d3   : > { %v1939_v13 = vpop.eup %1938 }
 0x2d4   : > { %v1430_v31 = vadd.f32 1e-05, %v1409_v7  ;;  %v1468_v14 = vmul.f32 %v1980_v34, %v1939_v13  ;;  %v1983_v34 = vld [vmem:[%s2288_s18 + $0x18] sm:$0xff] }
 0x2d5   : > { %v1344_v59 = vpop.xlane.xlu1 %1343 }
 0x2d6   : > { %1946 = vrsqrt.f32 %v1430_v31  ;;  %v1410_v0 = vmul.f32 0.0051020407, %v1344_v59  ;;  %1491 = vperm.xlu1 %1934, %v1468_v14  }
 0x2d7   : > { %v1941_v45 = vpop.eup %1940 }
 0x2d8   : > { %v1431_v50 = vadd.f32 1e-05, %v1410_v0  ;;  %v1469_v33 = vmul.f32 %v1981_v36, %v1941_v45 }
 0x2d9   : > { %v1348_v53 = vpop.xlane.xlu0 %1347 }
 0x2da   : > { %1948 = vrsqrt.f32 %v1431_v50  ;;  %v1411_v28 = vmul.f32 0.0051020407, %v1348_v53  ;;  %1496 = vperm.xlu0 %1935, %v1469_v33  }
 0x2db   : > { %v1943_v19 = vpop.eup %1942 }
 0x2dc   : > { %v1432_v20 = vadd.f32 1e-05, %v1411_v28  ;;  %v1470_v7 = vmul.f32 %v1982_v32, %v1943_v19 }
 0x2dd   : > { %v1352_v10 = vpop.xlane.xlu1 %1351 }
 0x2de   : > { %1950 = vrsqrt.f32 %v1432_v20  ;;  %v1412_v13 = vmul.f32 0.0051020407, %v1352_v10  ;;  %1501 = vperm.xlu1 %1934, %v1470_v7  }
 0x2df   : > { %v1945_v31 = vpop.eup %1944 }
 0x2e0   : > { %v1433_v59 = vadd.f32 1e-05, %v1412_v13  ;;  %v1471_v14 = vmul.f32 %v1983_v34, %v1945_v31 }
 0x2e1   : > { %v1356_v0 = vpop.xlane.xlu0 %1355 }
 0x2e2   : > { %1952 = vrsqrt.f32 %v1433_v59  ;;  %v1413_v49 = vmul.f32 0.0051020407, %v1356_v0  ;;  %1506 = vperm.xlu1 %1934, %v1471_v14  }
 0x2e3   : > { %v1947_v45 = vpop.eup %1946 }
 0x2e4   : > { %v1434_v50 = vadd.f32 1e-05, %v1413_v49  ;;  %v1472_v36 = vmul.f32 %v1947_v45, %v2681_v1 }
 0x2e5   : > { %v1360_v33 = vpop.xlane.xlu1 %1359 }
 0x2e6   : > { %1954 = vrsqrt.f32 %v1434_v50  ;;  %v1414_v53 = vmul.f32 0.0051020407, %v1360_v33  ;;  %1511 = vperm.xlu1 %1934, %v1472_v36  }
 0x2e7   : > { %v1949_v28 = vpop.eup %1948 }
 0x2e8   : > { %v1435_v19 = vadd.f32 1e-05, %v1414_v53  ;;  %v1473_v10 = vmul.f32 %v1949_v28, %v2678_v60 }
 0x2e9   : > { %v1364_v20 = vpop.xlane.xlu0 %1363 }
 0x2ea   : > { %1956 = vrsqrt.f32 %v1435_v19  ;;  %v1415_v32 = vmul.f32 0.0051020407, %v1364_v20  ;;  %1516 = vperm.xlu1 %1934, %v1473_v10  }
 0x2eb   : > { %v1951_v7 = vpop.eup %1950 }
 0x2ec   : > { %v1436_v13 = vadd.f32 1e-05, %v1415_v32  ;;  %v1474_v31 = vmul.f32 %v1951_v7, %v2936_v11 }
 0x2ed   : > { %v1368_v59 = vpop.xlane.xlu1 %1367 }
 0x2ee   : > { %1958 = vrsqrt.f32 %v1436_v13  ;;  %v1416_v49 = vmul.f32 0.0051020407, %v1368_v59  ;;  %1521 = vperm.xlu1 %1934, %v1474_v31  }
 0x2ef   : > { %v1953_v1 = vpop.eup %1952 }
 0x2f0   : > { %v1437_v34 = vadd.f32 1e-05, %v1416_v49  ;;  %v1475_v14 = vmul.f32 %v1953_v1, %v2925_v52 }
 0x2f1   : > { %v1372_v0 = vpop.xlane.xlu0 %1371 }
 0x2f2   : > { %1960 = vrsqrt.f32 %v1437_v34  ;;  %v1417_v45 = vmul.f32 0.0051020407, %v1372_v0  ;;  %1526 = vperm.xlu1 %1934, %v1475_v14  }
 0x2f3   : > { %v1955_v60 = vpop.eup %1954 }
 0x2f4   : > { %v1438_v50 = vadd.f32 1e-05, %v1417_v45  ;;  %v1476_v36 = vmul.f32 %v1955_v60, %v2944_v18 }
 0x2f5   : > { %v1376_v33 = vpop.xlane.xlu1 %1375 }
 0x2f6   : > { %1962 = vrsqrt.f32 %v1438_v50  ;;  %v1418_v53 = vmul.f32 0.0051020407, %v1376_v33  ;;  %1531 = vperm.xlu1 %1934, %v1476_v36  }
 0x2f7   : > { %v1957_v11 = vpop.eup %1956 }
 0x2f8   : > { %v1439_v28 = vadd.f32 1e-05, %v1418_v53  ;;  %v1477_v19 = vmul.f32 %v1957_v11, %v2929_v25 }
 0x2f9   : > { %v1380_v10 = vpop.xlane.xlu0 %1379 }
 0x2fa   : > { %1964 = vrsqrt.f32 %v1439_v28  ;;  %v1419_v20 = vmul.f32 0.0051020407, %v1380_v10  ;;  %1536 = vperm.xlu1 %1934, %v1477_v19  }
 0x2fb   : > { %v1959_v52 = vpop.eup %1958 }
 0x2fc   : > { %v1440_v32 = vadd.f32 1e-05, %v1419_v20  ;;  %v1478_v7 = vmul.f32 %v1959_v52, %v2952_v35 }
 0x2fd   : > { %v1384_v13 = vpop.xlane.xlu1 %1383 }
 0x2fe   : > { %1966 = vrsqrt.f32 %v1440_v32  ;;  %v1420_v31 = vmul.f32 0.0051020407, %v1384_v13  ;;  %1541 = vperm.xlu0 %1935, %v1478_v7  }
 0x2ff   : > { %v1961_v18 = vpop.eup %1960 }
 0x300   : > { %v1441_v59 = vadd.f32 1e-05, %v1420_v31  ;;  %v1479_v49 = vmul.f32 %v1961_v18, %v2933_v5 }
 0x301   : > { %v1388_v1 = vpop.xlane.xlu0 %1387 }
 0x302   : > { %1968 = vrsqrt.f32 %v1441_v59  ;;  %v1421_v34 = vmul.f32 0.0051020407, %v1388_v1  ;;  %1546 = vperm.xlu1 %1934, %v1479_v49   ;;  %v1129_v1 = vld [vmem:[%s2288_s18 + $0x98] sm:$0xff] }
 0x303   : > { %v1963_v25 = vpop.eup %1962 }
 0x304   : > { %v1442_v14 = vadd.f32 1e-05, %v1421_v34  ;;  %v1480_v0 = vmul.f32 %v1963_v25, %v2960_v61  ;;  %v1130_v25 = vld [vmem:[%s2288_s18 + $0xa0] sm:$0xff] }
 0x305   : > { %v1392_v45 = vpop.xlane.xlu1 %1391 }
 0x306   : > { %1970 = vrsqrt.f32 %v1442_v14  ;;  %v1422_v60 = vmul.f32 0.0051020407, %v1392_v45  ;;  %1551 = vperm.xlu0 %1935, %v1480_v0   ;;  %v3217_v45 = vmov 2  }
 0x307   : > { %v1965_v35 = vpop.eup %1964 }
 0x308   : > { %v1443_v50 = vadd.f32 1e-05, %v1422_v60  ;;  %v1481_v36 = vmul.f32 %v1965_v35, %v2941_v47 }
 0x309   : > { %v1396_v33 = vpop.xlane.xlu0 %1395 }
 0x30a   : > { %1972 = vrsqrt.f32 %v1443_v50  ;;  %v1423_v53 = vmul.f32 0.0051020407, %v1396_v33  ;;  %1556 = vperm.xlu1 %1934, %v1481_v36  }
 0x30b   : > { %v1967_v5 = vpop.eup %1966 }
 0x30c   : > { %v1444_v11 = vadd.f32 1e-05, %v1423_v53  ;;  %v1482_v28 = vmul.f32 %v1967_v5, %v2965_v63 }
 0x30d   : > { %v1400_v19 = vpop.xlane.xlu1 %1399 }
 0x30e   : > { %1974 = vrsqrt.f32 %v1444_v11  ;;  %v1424_v10 = vmul.f32 0.0051020407, %v1400_v19  ;;  %1561 = vperm.xlu0 %1935, %v1482_v28  }
 0x30f   : > { %v1969_v61 = vpop.eup %1968 }
 0x310   : > { %v1445_v20 = vadd.f32 1e-05, %v1424_v10  ;;  %v1483_v52 = vmul.f32 %v1969_v61, %v2949_v58 }
 0x311   : > { %v1404_v32 = vpop.xlane.xlu0 %1403 }
 0x312   : > { %1976 = vrsqrt.f32 %v1445_v20  ;;  %v1425_v47 = vmul.f32 0.0051020407, %v1404_v32  ;;  %1566 = vperm.xlu1 %1934, %v1483_v52  }
 0x313   : > { %v1971_v7 = vpop.eup %1970 }
 0x314   : > { %v1446_v13 = vadd.f32 1e-05, %v1425_v47  ;;  %v1484_v31 = vmul.f32 %v1971_v7, %v2969_v4  ;;  %v3003_v4 = vpop.permute.xlu1 %1673 }
 0x316   : > { %1978 = vrsqrt.f32 %v1446_v13  ;;  %1571 = vperm.xlu0 %1935, %v1484_v31  }
 0x317   : > { %v1973_v63 = vpop.eup %1972 }
 0x318   : > { %v1485_v18 = vmul.f32 %v1973_v63, %v2957_v16  ;;  %v3007_v60 = vpop.permute.xlu1 %1683 }
 0x319   : > { %v1669_v16 = vpop.permute.xlu0 %1668 }
 0x31a   : > { %1576 = vperm.xlu1 %1934, %v1485_v18  }
 0x31b   : > { %v1975_v59 = vpop.eup %1974 }
 0x31c   : > { %v1486_v49 = vmul.f32 %v1975_v59, %v2973_v48  ;;  %v3011_v50 = vpop.permute.xlu1 %1693 }
 0x31d   : > { %v3005_v48 = vpop.permute.xlu0 %1678 }
 0x31e   : > { %1581 = vperm.xlu0 %1935, %v1486_v49  }
 0x31f   : > { %v1977_v58 = vpop.eup %1976 }
 0x320   : > { %v1487_v34 = vmul.f32 %v1977_v58, %v1129_v1  ;;  %v3015_v33 = vpop.permute.xlu1 %1703 }
 0x321   : > { %v3009_v35 = vpop.permute.xlu0 %1688 }
 0x322   : > { %1586 = vperm.xlu1 %1934, %v1487_v34  }
 0x323   : > { %v1979_v14 = vpop.eup %1978 }
 0x324   : > { %v1488_v0 = vmul.f32 %v1979_v14, %v1130_v25  ;;  %v3019_v5 = vpop.permute.xlu1 %1713 }
 0x325   : > { %v3013_v36 = vpop.permute.xlu0 %1698 }
 0x326   : > { %1591 = vperm.xlu0 %1935, %v1488_v0   ;;  %1936 = vset.pattern.permute.xlu1 %v3217_v45 }
 0x327   : > { %1733 = vperm.xlu1 %1936, %v1129_v1  }
 0x328   : > { %v3023_v28 = vpop.permute.xlu1 %1723 }
 0x329   : > { %v3017_v53 = vpop.permute.xlu0 %1708 }
 0x32a   : > { %1937 = vset.pattern.permute.xlu0 %v3217_v45 }
 0x32b   : > { %1738 = vperm.xlu0 %1937, %v1130_v25  }
 0x32d   : > { %v3021_v11 = vpop.permute.xlu0 %1718 }
 0x331   : > { %v3026_v19 = vpop.permute.xlu0 %1728 }
 0x351   : > { %v1492_v10 = vpop.permute.xlu1 %1491 }
 0x352   : > { %v1594_v61 = vmul.f32 %v1492_v10, %v2694_v22  ;;  %v1595_v20 = vmul.f32 %v1492_v10, %v2697_v23 }
 0x354   : > { %v1741_v52 = vadd.f32 %v2685_v2, %v1594_v61  ;;  %v1742_v32 = vadd.f32 %v2685_v2, %v1595_v20 }
 0x355   : > { %v1497_v47 = vpop.permute.xlu0 %1496 }
 0x356   : > { %1783 = vst [vmem:[%s3033_s14] sm:$0xff] %v1741_v52  ;;  %1784 = vst.msk [vmem:[%s3033_s14 + $0x8] sm:$0xff] %vm1131_vm1, %v1742_v32  ;;  %v1596_v22 = vmul.f32 %v1497_v47, %v2704_v40  ;;  %v1597_v23 = vmul.f32 %v1497_v47, %v2707_v41 }
 0x358   : > { %v1743_v7 = vadd.f32 %v2689_v8, %v1596_v22  ;;  %v1744_v13 = vadd.f32 %v2689_v8, %v1597_v23 }
 0x359   : > { %v1502_v31 = vpop.permute.xlu1 %1501 }
 0x35a   : > { %1785 = vst [vmem:[%s3033_s14 + $0x10] sm:$0xff] %v1743_v7  ;;  %1786 = vst.msk [vmem:[%s3033_s14 + $0x18] sm:$0xff] %vm1131_vm1, %v1744_v13  ;;  %v1598_v2 = vmul.f32 %v1502_v31, %v2715_v57  ;;  %v1599_v63 = vmul.f32 %v1502_v31, %v2718_v21  ;;  %v3218_v13 = vld [vmem:[#allocation2_spill] sm:$0xff] }
 0x35c   : > { %v1745_v18 = vadd.f32 %v2687_v3, %v1598_v2  ;;  %v1746_v40 = vadd.f32 %v2687_v3, %v1599_v63 }
 0x35d   : > { %v1507_v41 = vpop.permute.xlu1 %1506 }
 0x35e   : > { %1787 = vst [vmem:[%s3033_s14 + $0x20] sm:$0xff] %v1745_v18  ;;  %1788 = vst.msk [vmem:[%s3033_s14 + $0x28] sm:$0xff] %vm1131_vm1, %v1746_v40  ;;  %v1600_v8 = vmul.f32 %v1507_v41, %v2726_v39  ;;  %v1601_v59 = vmul.f32 %v1507_v41, %v2729_v29  ;;  %v3220_v18 = vld [vmem:[#allocation4_spill] sm:$0xff] }
 0x360   : > { %v1747_v49 = vadd.f32 %v2691_v9, %v1600_v8  ;;  %v1748_v57 = vadd.f32 %v2691_v9, %v1601_v59 }
 0x361   : > { %v1512_v21 = vpop.permute.xlu1 %1511 }
 0x362   : > { %1789 = vst [vmem:[%s3033_s14 + $0x30] sm:$0xff] %v1747_v49  ;;  %1790 = vst.msk [vmem:[%s3033_s14 + $0x38] sm:$0xff] %vm1131_vm1, %v1748_v57  ;;  %v1602_v3 = vmul.f32 %v1512_v21, %v2737_v56  ;;  %v1603_v1 = vmul.f32 %v1512_v21, %v2740_v37  ;;  %v3222_v49 = vld [vmem:[#allocation6_spill] sm:$0xff] }
 0x364   : > { %v1749_v58 = vadd.f32 %v2976_v55, %v1602_v3  ;;  %v1750_v39 = vadd.f32 %v2976_v55, %v1603_v1 }
 0x365   : > { %v1517_v29 = vpop.permute.xlu1 %1516 }
 0x366   : > { %1791 = vst [vmem:[%s3033_s14 + $0x40] sm:$0xff] %v1749_v58  ;;  %1792 = vst.msk [vmem:[%s3033_s14 + $0x48] sm:$0xff] %vm1131_vm1, %v1750_v39  ;;  %v1604_v9 = vmul.f32 %v1517_v29, %v2748_v30  ;;  %v1605_v34 = vmul.f32 %v1517_v29, %v2751_v46  ;;  %v3224_v39 = vld [vmem:[#allocation8_spill] sm:$0xff] }
 0x368   : > { %v1751_v25 = vadd.f32 %v2978_v15, %v1604_v9  ;;  %v1752_v56 = vadd.f32 %v2978_v15, %v1605_v34 }
 0x369   : > { %v1522_v37 = vpop.permute.xlu1 %1521 }
 0x36a   : > { %1793 = vst [vmem:[%s3033_s14 + $0x50] sm:$0xff] %v1751_v25  ;;  %1794 = vst.msk [vmem:[%s3033_s14 + $0x58] sm:$0xff] %vm1131_vm1, %v1752_v56  ;;  %v1606_v55 = vmul.f32 %v1522_v37, %v2759_v51  ;;  %v1607_v14 = vmul.f32 %v1522_v37, %v2762_v54  ;;  %v3226_v37 = vld [vmem:[#allocation10_spill] sm:$0xff] }
 0x36c   : > { %v1753_v0 = vadd.f32 %v1669_v16, %v1606_v55  ;;  %v1754_v45 = vadd.f32 %v1669_v16, %v1607_v14 }
 0x36d   : > { %v1527_v30 = vpop.permute.xlu1 %1526 }
 0x36e   : > { %1795 = vst [vmem:[%s3033_s14 + $0x60] sm:$0xff] %v1753_v0  ;;  %1796 = vst.msk [vmem:[%s3033_s14 + $0x68] sm:$0xff] %vm1131_vm1, %v1754_v45  ;;  %v1608_v15 = vmul.f32 %v1527_v30, %v2770_v27  ;;  %v1609_v46 = vmul.f32 %v1527_v30, %v2773_v62 }
 0x370   : > { %v1755_v10 = vadd.f32 %v3003_v4, %v1608_v15  ;;  %v1756_v61 = vadd.f32 %v3003_v4, %v1609_v46  ;;  %v3228_v15 = vld [vmem:[#allocation12_spill] sm:$0xff] }
 0x371   : > { %v1532_v51 = vpop.permute.xlu1 %1531 }
 0x372   : > { %1797 = vst [vmem:[%s3033_s14 + $0x70] sm:$0xff] %v1755_v10  ;;  %1798 = vst.msk [vmem:[%s3033_s14 + $0x78] sm:$0xff] %vm1131_vm1, %v1756_v61  ;;  %v1610_v54 = vmul.f32 %v1532_v51, %v2781_v12  ;;  %v1611_v16 = vmul.f32 %v1532_v51, %v2784_v6 }
 0x374   : > { %v1757_v20 = vadd.f32 %v3005_v48, %v1610_v54  ;;  %v1758_v27 = vadd.f32 %v3005_v48, %v1611_v16  ;;  %v3229_v54 = vld [vmem:[#allocation13_spill] sm:$0xff]  ;;  %v3230_v16 = vld [vmem:[#allocation14_spill] sm:$0xff] }
 0x375   : > { %v1537_v62 = vpop.permute.xlu1 %1536 }
 0x376   : > { %1799 = vst [vmem:[%s3033_s14 + $0x80] sm:$0xff] %v1757_v20  ;;  %1800 = vst.msk [vmem:[%s3033_s14 + $0x88] sm:$0xff] %vm1131_vm1, %v1758_v27  ;;  %v1612_v4 = vmul.f32 %v1537_v62, %v2792_v24  ;;  %v1613_v52 = vmul.f32 %v1537_v62, %v2795_v17 }
 0x378   : > { %v1759_v32 = vadd.f32 %v3007_v60, %v1612_v4  ;;  %v1760_v12 = vadd.f32 %v3007_v60, %v1613_v52 }
 0x379   : > { %v1542_v6 = vpop.permute.xlu0 %1541 }
 0x37a   : > { %1801 = vst [vmem:[%s3033_s14 + $0x90] sm:$0xff] %v1759_v32  ;;  %1802 = vst.msk [vmem:[%s3033_s14 + $0x98] sm:$0xff] %vm1131_vm1, %v1760_v12  ;;  %v1614_v48 = vmul.f32 %v1542_v6, %v2803_v43  ;;  %v1615_v47 = vmul.f32 %v1542_v6, %v2806_v26  ;;  %v3232_v32 = vld [vmem:[#allocation16_spill] sm:$0xff] }
 0x37c   : > { %v1761_v22 = vadd.f32 %v3009_v35, %v1614_v48  ;;  %v1762_v24 = vadd.f32 %v3009_v35, %v1615_v47 }
 0x37d   : > { %v1547_v17 = vpop.permute.xlu1 %1546 }
 0x37e   : > { %1803 = vst [vmem:[%s3033_s14 + $0xa0] sm:$0xff] %v1761_v22  ;;  %1804 = vst.msk [vmem:[%s3033_s14 + $0xa8] sm:$0xff] %vm1131_vm1, %v1762_v24  ;;  %v1616_v60 = vmul.f32 %v1547_v17, %v2814_v44  ;;  %v1617_v23 = vmul.f32 %v1547_v17, %v2817_v38  ;;  %v3233_v24 = vld [vmem:[#allocation17_spill] sm:$0xff] }
 0x380   : > { %v1763_v7 = vadd.f32 %v3011_v50, %v1616_v60  ;;  %v1764_v43 = vadd.f32 %v3011_v50, %v1617_v23  ;;  %v3219_v50 = vld [vmem:[#allocation3_spill] sm:$0xff]  ;;  %v3234_v60 = vld [vmem:[#allocation18_spill] sm:$0xff] }
 0x381   : > { %v1552_v26 = vpop.permute.xlu0 %1551 }
 0x382   : > { %1805 = vst [vmem:[%s3033_s14 + $0xb0] sm:$0xff] %v1763_v7  ;;  %1806 = vst.msk [vmem:[%s3033_s14 + $0xb8] sm:$0xff] %vm1131_vm1, %v1764_v43  ;;  %v1618_v35 = vmul.f32 %v1552_v26, %v2825_v42  ;;  %v1619_v31 = vmul.f32 %v1552_v26, %v3218_v13 }
 0x384   : > { %v1765_v2 = vadd.f32 %v3013_v36, %v1618_v35  ;;  %v1766_v44 = vadd.f32 %v3013_v36, %v1619_v31  ;;  %v3221_v36 = vld [vmem:[#allocation5_spill] sm:$0xff] }
 0x385   : > { %v1557_v38 = vpop.permute.xlu1 %1556 }
 0x386   : > { %1807 = vst [vmem:[%s3033_s14 + $0xc0] sm:$0xff] %v1765_v2  ;;  %1808 = vst.msk [vmem:[%s3033_s14 + $0xc8] sm:$0xff] %vm1131_vm1, %v1766_v44  ;;  %v1620_v63 = vmul.f32 %v1557_v38, %v3219_v50  ;;  %v1621_v40 = vmul.f32 %v1557_v38, %v3220_v18 }
 0x388   : > { %v1767_v41 = vadd.f32 %v3015_v33, %v1620_v63  ;;  %v1768_v42 = vadd.f32 %v3015_v33, %v1621_v40  ;;  %v3223_v33 = vld [vmem:[#allocation7_spill] sm:$0xff] }
 0x389   : > { %v1562_v8 = vpop.permute.xlu0 %1561 }
 0x38a   : > { %1809 = vst [vmem:[%s3033_s14 + $0xd0] sm:$0xff] %v1767_v41  ;;  %1810 = vst.msk [vmem:[%s3033_s14 + $0xd8] sm:$0xff] %vm1131_vm1, %v1768_v42  ;;  %v1622_v59 = vmul.f32 %v1562_v8, %v3221_v36  ;;  %v1623_v57 = vmul.f32 %v1562_v8, %v3222_v49 }
 0x38c   : > { %v1769_v21 = vadd.f32 %v3017_v53, %v1622_v59  ;;  %v1770_v3 = vadd.f32 %v3017_v53, %v1623_v57  ;;  %v3225_v53 = vld [vmem:[#allocation9_spill] sm:$0xff] }
 0x38d   : > { %v1567_v1 = vpop.permute.xlu1 %1566 }
 0x38e   : > { %1811 = vst [vmem:[%s3033_s14 + $0xe0] sm:$0xff] %v1769_v21  ;;  %1812 = vst.msk [vmem:[%s3033_s14 + $0xe8] sm:$0xff] %vm1131_vm1, %v1770_v3  ;;  %v1624_v58 = vmul.f32 %v1567_v1, %v3223_v33  ;;  %v1625_v29 = vmul.f32 %v1567_v1, %v3224_v39 }
 0x390   : > { %v1771_v9 = vadd.f32 %v3019_v5, %v1624_v58  ;;  %v1772_v34 = vadd.f32 %v3019_v5, %v1625_v29  ;;  %v3227_v5 = vld [vmem:[#allocation11_spill] sm:$0xff] }
 0x391   : > { %v1572_v25 = vpop.permute.xlu0 %1571 }
 0x392   : > { %1813 = vst [vmem:[%s3033_s14 + $0xf0] sm:$0xff] %v1771_v9  ;;  %1814 = vst.msk [vmem:[%s3033_s14 + $0xf8] sm:$0xff] %vm1131_vm1, %v1772_v34  ;;  %v1626_v56 = vmul.f32 %v1572_v25, %v3225_v53  ;;  %v1627_v55 = vmul.f32 %v1572_v25, %v3226_v37 }
 0x394   : > { %v1773_v14 = vadd.f32 %v3021_v11, %v1626_v56  ;;  %v1774_v0 = vadd.f32 %v3021_v11, %v1627_v55 }
 0x395   : > { %v1577_v45 = vpop.permute.xlu1 %1576 }
 0x396   : > { %1815 = vst [vmem:[%s3033_s14 + $0x100] sm:$0xff] %v1773_v14  ;;  %1816 = vst.msk [vmem:[%s3033_s14 + $0x108] sm:$0xff] %vm1131_vm1, %v1774_v0  ;;  %v1628_v30 = vmul.f32 %v1577_v45, %v3227_v5  ;;  %v1629_v46 = vmul.f32 %v1577_v45, %v3228_v15 }
 0x398   : > { %v1775_v10 = vadd.f32 %v3023_v28, %v1628_v30  ;;  %v1776_v61 = vadd.f32 %v3023_v28, %v1629_v46  ;;  %v3231_v28 = vld [vmem:[#allocation15_spill] sm:$0xff] }
 0x399   : > { %v1582_v51 = vpop.permute.xlu0 %1581 }
 0x39a   : > { %1817 = vst [vmem:[%s3033_s14 + $0x110] sm:$0xff] %v1775_v10  ;;  %1818 = vst.msk [vmem:[%s3033_s14 + $0x118] sm:$0xff] %vm1131_vm1, %v1776_v61  ;;  %v1630_v11 = vmul.f32 %v1582_v51, %v3229_v54  ;;  %v1631_v20 = vmul.f32 %v1582_v51, %v3230_v16 }
 0x39c   : > { %v1777_v27 = vadd.f32 %v3026_v19, %v1630_v11  ;;  %v1778_v62 = vadd.f32 %v3026_v19, %v1631_v20 }
 0x39d   : > { %v1587_v4 = vpop.permute.xlu1 %1586 }
 0x39e   : > { %1819 = vst [vmem:[%s3033_s14 + $0x120] sm:$0xff] %v1777_v27  ;;  %1820 = vst.msk [vmem:[%s3033_s14 + $0x128] sm:$0xff] %vm1131_vm1, %v1778_v62  ;;  %v1632_v52 = vmul.f32 %v1587_v4, %v3231_v28  ;;  %v1633_v12 = vmul.f32 %v1587_v4, %v3232_v32 }
 0x3a1   : > { %v1592_v6 = vpop.permute.xlu0 %1591 }
 0x3a2   : > { %v1734_v48 = vpop.permute.xlu1 %1733  ;;  %v1634_v17 = vmul.f32 %v1592_v6, %v3233_v24  ;;  %v1635_v23 = vmul.f32 %v1592_v6, %v3234_v60 }
 0x3a3   : > { %v1779_v47 = vadd.f32 %v1734_v48, %v1632_v52  ;;  %v1780_v22 = vadd.f32 %v1734_v48, %v1633_v12 }
 0x3a5   : > { %1821 = vst [vmem:[%s3033_s14 + $0x130] sm:$0xff] %v1779_v47  ;;  %1822 = vst.msk [vmem:[%s3033_s14 + $0x138] sm:$0xff] %vm1131_vm1, %v1780_v22 }
 0x3a6   : > { %v1739_v19 = vpop.permute.xlu0 %1738 }
 0x3a7   : > { %v1781_v7 = vadd.f32 %v1739_v19, %v1634_v17  ;;  %v1782_v43 = vadd.f32 %v1739_v19, %v1635_v23 }
 0x3a9   : > { %1823 = vst [vmem:[%s3033_s14 + $0x140] sm:$0xff] %v1781_v7  ;;  %1824 = vst.msk [vmem:[%s3033_s14 + $0x148] sm:$0xff] %vm1131_vm1, %v1782_v43 }
 0x3aa PF: > { %s13_s12 = sadd.s32 1, %s1990_s12  }
 0x3ab   : > { %p10_p4 = scmp.ge.s32.totalorder %s13_s12, 4  }
 0x3ad   :  { %12 = sbr.rel (!%p10_p4) target bundleno = 1 (0x1), region = 63 }

</bundles_post_ra>
